<compile_context>
chip_gen: v5e
topology: v5e:2x2
jax: 0.10.0
libtpu: 0.0.40
codegen_flags: <defaults>
</compile_context>

<pallas_src>
import functools

import jax
import jax.numpy as jnp
from jax.experimental import pallas as pl
from jax.experimental.pallas import tpu as pltpu


# ----------------------------------------------------------------------------
# Kernel 1: fused encoder  Conv(1->48) + ReLU + Conv(48->F), row-band tiled
# ----------------------------------------------------------------------------
def _encoder_kernel(p1_ref, mask_ref, w1_ref, b1_ref, w2_ref, b2_ref, o_ref,
                    h1_ref, *, tm, Wp2, c1, F):
    # p1_ref:   ((tm+2)*Wp2, 9)  bf16 im2col of the 1-ch input, this row band
    # mask_ref: ((tm+2)*Wp2, 1)  f32  1 inside / 0 on the 1-px border
    #                                 (== conv2's zero padding of conv1 output)
    # w1_ref:   (9, c1) bf16 ;  b1_ref: (1, c1) f32
    # w2_ref:   (9, c1, F) bf16 per-tap conv2 weights ;  b2_ref: (1, F) f32
    # o_ref:    (tm*Wp2, F) f32  (cols W..Wp2-1 of each row are junk -> wrapper)
    # h1_ref:   ((tm+2)*Wp2 + 8, c1) bf16 scratch (pad rows so shifted windows
    #           never read past the allocation)
    nrow = (tm + 2) * Wp2
    npix = tm * Wp2

    # conv1: single K=9 MXU matmul (bf16 operands, f32 accumulation)
    h1 = jnp.dot(p1_ref[...], w1_ref[...], preferred_element_type=jnp.float32)
    h1 = jnp.maximum(h1 + b1_ref[...], 0.0) * mask_ref[...]
    h1_ref[0:nrow, :] = h1.astype(jnp.bfloat16)
    h1_ref[nrow:nrow + 8, :] = jnp.zeros((8, c1), jnp.bfloat16)

    # conv2: 9 accumulated tap matmuls on contiguous shifted windows of the
    # flat h1 scratch (no im2col concat, no reshape).  Row wrap-around only
    # pollutes the 2 junk columns per row that the wrapper discards.
    acc = jnp.zeros((npix, F), jnp.float32)
    for ky in range(3):
        for kx in range(3):
            shift = ky * Wp2 + kx
            win = h1_ref[shift:shift + npix, :]               # (npix, c1) bf16
            acc = acc + jnp.dot(win, w2_ref[ky * 3 + kx],
                                preferred_element_type=jnp.float32)
    o_ref[...] = acc + b2_ref[...]


def _pick_band_rows(H):
    # Largest divisor of H that is a multiple of 8 (keeps the (tm*Wp2, F)
    # output block 8-row aligned) and small enough to give >= 2 grid steps.
    cap = max(8, min(64, H // 2))
    for tm in range(cap, 7, -1):
        if H % tm == 0 and tm % 8 == 0:
            return tm
    return H                                      # single-band fallback


def encode_image(x_hwc, w1c, b1c, w2c, b2c):
    H, W, _ = x_hwc.shape
    c1 = w1c.shape[-1]
    F = w2c.shape[-1]
    Hp2, Wp2 = H + 2, W + 2
    tm = _pick_band_rows(H)
    nb = H // tm
    rows_b = (tm + 2) * Wp2

    # im2col of the 1-channel input over the (H+2, W+2) extended conv1 domain
    xpad2 = jnp.pad(x_hwc[:, :, 0], ((2, 2), (2, 2)))
    taps = [xpad2[ky:ky + Hp2, kx:kx + Wp2] for ky in range(3) for kx in range(3)]
    p1 = jnp.stack(taps, axis=-1)                              # (Hp2, Wp2, 9)

    rr = jnp.arange(Hp2)[:, None]
    cc = jnp.arange(Wp2)[None, :]
    mask = (((rr >= 1) & (rr <= H)) & ((cc >= 1) & (cc <= W)))
    mask = mask.astype(jnp.float32)[:, :, None]                # (Hp2, Wp2, 1)

    # overlapping row bands (2-row halo) pre-sliced & flattened in the wrapper
    def to_bands(a):                                           # (Hp2, Wp2, ch)
        b = jnp.stack([a[i * tm:i * tm + tm + 2] for i in range(nb)], axis=0)
        return b.reshape(nb, rows_b, a.shape[-1])

    p1_b = to_bands(p1).astype(jnp.bfloat16)                   # (nb, rows_b, 9)
    mask_b = to_bands(mask)                                    # (nb, rows_b, 1)

    w1r = w1c.reshape(9, c1).astype(jnp.bfloat16)
    b1r = b1c.reshape(1, c1)
    w2r = w2c.reshape(9, c1, F).astype(jnp.bfloat16)
    b2r = b2c.reshape(1, F)

    kern = functools.partial(_encoder_kernel, tm=tm, Wp2=Wp2, c1=c1, F=F)
    out = pl.pallas_call(
        kern,
        grid=(nb,),
        in_specs=[
            pl.BlockSpec((None, rows_b, 9), lambda i: (i, 0, 0)),
            pl.BlockSpec((None, rows_b, 1), lambda i: (i, 0, 0)),
            pl.BlockSpec(w1r.shape, lambda i: (0, 0)),
            pl.BlockSpec(b1r.shape, lambda i: (0, 0)),
            pl.BlockSpec(w2r.shape, lambda i: (0, 0, 0)),
            pl.BlockSpec(b2r.shape, lambda i: (0, 0)),
        ],
        out_specs=pl.BlockSpec((tm * Wp2, F), lambda i: (i, 0)),
        out_shape=jax.ShapeDtypeStruct((H * Wp2, F), jnp.float32),
        scratch_shapes=[pltpu.VMEM((rows_b + 8, c1), jnp.bfloat16)],
        compiler_params=pltpu.CompilerParams(
            dimension_semantics=("parallel",)),
    )(p1_b, mask_b, w1r, b1r, w2r, b2r)
    # drop the 2 junk columns per row produced by the shifted-window conv2
    return out.reshape(H, Wp2, F)[:, :W, :]


# ----------------------------------------------------------------------------
# Kernel 2: fused grid_sample + multi-level encoding + MLP decoder (transposed)
# ----------------------------------------------------------------------------
def _axis_weights_t(coord, size, iota_sub, zero_pad):
    # coord: (1, tn) continuous coordinate (pixel units) along an axis of `size`
    # iota_sub: (size, tn) sublane iota.  Returns (size, tn) 1-D bilinear
    # weights (two nonzeros per column); row-weight * column-weight is exactly
    # the 2-D bilinear weight (zeros padding handled per axis).
    c0 = jnp.floor(coord)
    frac = coord - c0
    total = None
    for d in (0, 1):
        ci = c0 + float(d)
        w = frac if d else (1.0 - frac)
        if zero_pad:       # padding_mode='zeros': out-of-range corners give 0
            w = w * ((ci >= 0.0) & (ci <= size - 1.0)).astype(jnp.float32)
        cc = jnp.clip(ci, 0.0, size - 1.0)
        oh = jnp.where(iota_sub == cc, w, 0.0)
        total = oh if total is None else total + oh
    return total


def _decode_kernel(xy_ref, ga_ref, ge_ref, wc_ref, w2_ref, w3_ref, o_ref, *,
                   Hp, Wp, tn, level_res):
    f32, bf16 = jnp.float32, jnp.bfloat16
    xy = xy_ref[...]                                 # (2, tn), values in [-1, 1]

    iotas = {}

    def iota(n):   # one hoisted sublane iota per distinct size per tile
        if n not in iotas:
            iotas[n] = jax.lax.broadcasted_iota(f32, (n, tn), 0)
        return iotas[n]

    # grid_sample(feat_pad, xy.flip(-1), bilinear, zeros, align_corners=True)
    gy = xy[0:1, :]                                  # y -> height
    gx = xy[1:2, :]                                  # x -> width (flipped)
    yf = (gy + 1.0) * 0.5 * (Hp - 1)
    xf = (gx + 1.0) * 0.5 * (Wp - 1)
    # multi-resolution encoding coordinates (tcnn.Encoding stand-in)
    u01 = jnp.clip((xy + 1.0) * 0.5, 0.0, 1.0)
    uu = u01[0:1, :]
    vv = u01[1:2, :]

    # per-axis one-hot bilinear weights: grid-sample block first, then one block
    # per encoding level (sublane concat -> no lane relayouts, all VPU work).
    r_blk = [_axis_weights_t(yf, Hp, iota(Hp), True)]
    c_blk = [_axis_weights_t(xf, Wp, iota(Wp), True)]
    for R in level_res:
        r_blk.append(_axis_weights_t(vv * (R - 1.0), R, iota(R), False))
        c_blk.append(_axis_weights_t(uu * (R - 1.0), R, iota(R), False))
    rw = jnp.concatenate(r_blk, axis=0).astype(bf16)          # (Hp+sumR, tn)
    cw = jnp.concatenate(c_blk, axis=0).astype(bf16)          # (Wp+sumR, tn)

    # grid-sample + all encoding levels fused into two block-diagonal matmuls
    rows_all = jnp.dot(ga_ref[...], rw, preferred_element_type=f32)  # (Dg, tn)
    cexp_all = jnp.dot(ge_ref[...], cw, preferred_element_type=f32)  # (Dg, tn)
    g = (rows_all * cexp_all).astype(bf16)

    # decoder MLP; the 0/1 fold matrices are pre-composed into wc_ref in the
    # wrapper, so the first layer also folds the gathered features (no concat).
    h = jnp.maximum(jnp.dot(wc_ref[...], g, preferred_element_type=f32), 0.0)
    h = jnp.maximum(jnp.dot(w2_ref[...], h.astype(bf16),
                            preferred_element_type=f32), 0.0)
    o_ref[...] = jnp.dot(w3_ref[...], h.astype(bf16),
                         preferred_element_type=f32)          # (1, tn) lane-dense


def _expand_matrix(R, F):
    # (R, R*F) with E[x, x*F + f] = 1
    j = jnp.arange(R * F)[None, :] // F
    x = jnp.arange(R)[:, None]
    return (j == x).astype(jnp.float32)


def _fold_matrix(R, F):
    # (R*F, F) with fold[x*F + f, f] = 1
    j = jnp.arange(R * F)[:, None] % F
    f = jnp.arange(F)[None, :]
    return (j == f).astype(jnp.float32)


def _block_diag(blocks):
    rows = sum(b.shape[0] for b in blocks)
    cols = sum(b.shape[1] for b in blocks)
    out = jnp.zeros((rows, cols), jnp.float32)
    r = c = 0
    for b in blocks:
        out = out.at[r:r + b.shape[0], c:c + b.shape[1]].set(b.astype(jnp.float32))
        r += b.shape[0]
        c += b.shape[1]
    return out


def _run_decode(xyT, ga, ge, wc, w2t, w3t, *, Hp, Wp, level_res, tn, buffered):
    N = xyT.shape[1]
    kern = functools.partial(_decode_kernel, Hp=Hp, Wp=Wp, tn=tn,
                             level_res=tuple(level_res))

    def const_spec(shape):
        imap = lambda i: (0, 0)
        if buffered:
            # grid-invariant operand -> single-buffer it (halves its VMEM)
            return pl.BlockSpec(shape, imap, pipeline_mode=pl.Buffered(1))
        return pl.BlockSpec(shape, imap)

    return pl.pallas_call(
        kern,
        grid=(N // tn,),
        in_specs=[
            pl.BlockSpec((2, tn), lambda i: (0, i)),          # xy, lane-dense
            const_spec(ga.shape),
            const_spec(ge.shape),
            const_spec(wc.shape),
            const_spec(w2t.shape),
            const_spec(w3t.shape),
        ],
        out_specs=pl.BlockSpec((1, tn), lambda i: (0, i)),
        out_shape=jax.ShapeDtypeStruct((1, N), jnp.float32),
        compiler_params=pltpu.CompilerParams(
            dimension_semantics=("parallel",)),
    )(xyT, ga, ge, wc, w2t, w3t)


def sample_and_decode(xy_flat, feat_pad, tables, level_res, w1, w2, w3, tn=None):
    N = xy_flat.shape[0]
    Hp, Wp, F = feat_pad.shape
    fpl = tables.shape[1]
    bf16 = jnp.bfloat16

    if tn is None:
        # tn=128 fills the 128-wide MXU; use 256 only when there are enough
        # samples for >= 4 "parallel" grid steps (v7x: 2 TCs want >= 2 each).
        tn = 256 if (N % 256 == 0 and N >= 1024) else 128
    assert N % tn == 0, "sample count must be a multiple of the tile size"

    # ---- transposed, block-diagonal fused operands (built f32, cast bf16) ----
    #   rows_all = GA @ rw     GA = blockdiag(fm_rows.T, table_l.T ...)
    #   cexp_all = GE @ cw     GE = blockdiag(e_sel.T,   e_enc_l.T ...)
    #   h        = relu(WC @ (rows_all * cexp_all))   WC = [f_sel@wd1_a; f_enc@wd1_b].T
    fmT = feat_pad.reshape(Hp, Wp * F).T                       # (Wp*F, Hp)
    ga_blocks = [fmT]
    ge_blocks = [_expand_matrix(Wp, F).T]
    fold_blocks = [_fold_matrix(Wp, F)]
    off = 0
    for R in level_res:
        ga_blocks.append(tables[off:off + R * R, :].reshape(R, R * fpl).T)
        ge_blocks.append(_expand_matrix(R, fpl).T)
        fold_blocks.append(_fold_matrix(R, fpl))
        off += R * R
    ga = _block_diag(ga_blocks).astype(bf16)       # (Wp*F + sumRF, Hp + sumR)
    ge = _block_diag(ge_blocks).astype(bf16)       # (Wp*F + sumRF, Wp + sumR)

    f_sel = fold_blocks[0]                         # (Wp*F, F)
    f_enc = _block_diag(fold_blocks[1:])           # (sumRF, n_levels*fpl)
    wc = jnp.concatenate([f_sel @ w1[:F, :], f_enc @ w1[F:, :]], axis=0)
    wc = wc.T.astype(bf16)                         # (n_neurons, Wp*F + sumRF)
    w2t = w2.T.astype(bf16)
    w3t = w3.T.astype(bf16)                        # (1, n_neurons)

    xyT = xy_flat.T                                # (2, N), lane-dense samples

    kwargs = dict(Hp=Hp, Wp=Wp, level_res=level_res, tn=tn)
    try:
        out = jax.block_until_ready(
            _run_decode(xyT, ga, ge, wc, w2t, w3t, buffered=True, **kwargs))
    except Exception:   # pl.Buffered(1) unsupported on this Pallas -> default
        out = _run_decode(xyT, ga, ge, wc, w2t, w3t, buffered=False, **kwargs)
    return out.reshape(N, 1)


# ----------------------------------------------------------------------------
# Full SpenerNet forward (wrapper glue)
# ----------------------------------------------------------------------------
def spener_forward(params, img_nchw, xy):
    bs, _, H, W = img_nchw.shape
    assert bs == 1  # grid_sample in the reference uses a batch-1 sampling grid
    _, sample_num, length, _ = xy.shape
    assert length >= H and length >= W

    x_hwc = jnp.transpose(img_nchw[0], (1, 2, 0))              # (H, W, 1)
    feat = encode_image(x_hwc, params["w1c"], params["b1c"],
                        params["w2c"], params["b2c"])          # (H, W, F)

    # replicate padding -- reproduces the PyTorch reference's F.pad exactly,
    # including its cross-wired (l, r) <-> H and (t, b) <-> W pairing.
    pad_left = (length - H) // 2
    pad_right = length - H - pad_left
    pad_top = (length - W) // 2
    pad_bottom = length - W - pad_top
    feat_p = jnp.pad(feat, ((pad_top, pad_bottom), (pad_left, pad_right), (0, 0)),
                     mode="edge")

    xy_flat = xy.reshape(-1, 2)
    return sample_and_decode(xy_flat, feat_p, params["tables"],
                             params["level_res"],
                             params["wd1"], params["wd2"], params["wd3"])


def init_params(key, feature_dim=32, n_levels=4, n_features_per_level=2,
                base_resolution=4, n_neurons=64):
    ks = jax.random.split(key, 8)

    def unif(k, shape, scale):
        return jax.random.uniform(k, shape, jnp.float32, -scale, scale)

    level_res = tuple(base_resolution * (2 ** l) for l in range(n_levels))
    total_entries = sum(r * r for r in level_res)
    enc_dim = n_levels * n_features_per_level
    din = feature_dim + enc_dim
    return dict(
        w1c=unif(ks[0], (3, 3, 1, 48), (1.0 / 9.0) ** 0.5),
        b1c=unif(ks[1], (48,), (1.0 / 9.0) ** 0.5),
        w2c=unif(ks[2], (3, 3, 48, feature_dim), (1.0 / (9 * 48)) ** 0.5),
        b2c=unif(ks[3], (feature_dim,), (1.0 / (9 * 48)) ** 0.5),
        tables=unif(ks[4], (total_entries, n_features_per_level), 0.1),
        wd1=unif(ks[5], (din, n_neurons), din ** -0.5),
        wd2=unif(ks[6], (n_neurons, n_neurons), n_neurons ** -0.5),
        wd3=unif(ks[7], (n_neurons, 1), n_neurons ** -0.5),
        level_res=level_res,
    )


# ----------------------------------------------------------------------------
# Pure-JAX reference (f32) for a tolerance check of the bf16 Pallas pipeline
# ----------------------------------------------------------------------------
def _ref_bilinear(grid_vals, xpix, ypix, zero_pad):
    Hn, Wn, C = grid_vals.shape
    x0 = jnp.floor(xpix)
    y0 = jnp.floor(ypix)
    tx = xpix - x0
    ty = ypix - y0
    out = jnp.zeros((xpix.shape[0], C), jnp.float32)
    for dy in (0, 1):
        for dx in (0, 1):
            xi = x0 + dx
            yi = y0 + dy
            w = (tx if dx else 1.0 - tx) * (ty if dy else 1.0 - ty)
            if zero_pad:
                w = w * ((xi >= 0) & (xi <= Wn - 1) & (yi >= 0) & (yi <= Hn - 1))
            xc = jnp.clip(xi, 0, Wn - 1).astype(jnp.int32)
            yc = jnp.clip(yi, 0, Hn - 1).astype(jnp.int32)
            out = out + w[:, None] * grid_vals[yc, xc, :]
    return out


def _reference_forward(params, img_nchw, xy):
    x = img_nchw[0, 0]
    H, W = x.shape
    w1c, b1c, w2c, b2c = (params["w1c"], params["b1c"],
                          params["w2c"], params["b2c"])
    c1, F = w1c.shape[-1], w2c.shape[-1]
    xp = jnp.pad(x, 1)
    h1 = jnp.zeros((H, W, c1), jnp.float32)
    for ky in range(3):
        for kx in range(3):
            h1 = h1 + xp[ky:ky + H, kx:kx + W, None] * w1c[ky, kx, 0][None, None, :]
    h1 = jnp.maximum(h1 + b1c, 0.0)
    h1p = jnp.pad(h1, ((1, 1), (1, 1), (0, 0)))
    feat = jnp.zeros((H, W, F), jnp.float32)
    for ky in range(3):
        for kx in range(3):
            feat = feat + jnp.einsum("hwc,cf->hwf",
                                     h1p[ky:ky + H, kx:kx + W, :], w2c[ky, kx])
    feat = feat + b2c

    _, sample_num, length, _ = xy.shape
    pad_left = (length - H) // 2
    pad_right = length - H - pad_left
    pad_top = (length - W) // 2
    pad_bottom = length - W - pad_top
    feat_p = jnp.pad(feat, ((pad_top, pad_bottom), (pad_left, pad_right), (0, 0)),
                     mode="edge")
    Hp, Wp, _ = feat_p.shape

    xyf = xy.reshape(-1, 2)
    xf = (xyf[:, 1] + 1.0) * 0.5 * (Wp - 1)
    yf = (xyf[:, 0] + 1.0) * 0.5 * (Hp - 1)
    select_vec = _ref_bilinear(feat_p, xf, yf, zero_pad=True)

    u01 = jnp.clip((xyf + 1.0) * 0.5, 0.0, 1.0)
    uu, vv = u01[:, 0], u01[:, 1]
    enc = []
    off = 0
    fpl = params["tables"].shape[1]
    for R in params["level_res"]:
        tbl = params["tables"][off:off + R * R].reshape(R, R, fpl)
        enc.append(_ref_bilinear(tbl, uu * (R - 1), vv * (R - 1), zero_pad=False))
        off += R * R
    coord_vec = jnp.concatenate(enc, axis=1)

    din = jnp.concatenate([select_vec, coord_vec], axis=1)
    h = jnp.maximum(din @ params["wd1"], 0.0)
    h = jnp.maximum(h @ params["wd2"], 0.0)
    return h @ params["wd3"]


if __name__ == "__main__":
    key = jax.random.PRNGKey(0)
    k_img, k_xy, k_par = jax.random.split(key, 3)

    bs, H, W = 1, 16, 16
    sample_num, length = 8, 32            # length >= H, W (replicate-pad target)

    img = jax.random.normal(k_img, (bs, 1, H, W), jnp.float32)            # NCHW
    xy = jax.random.uniform(k_xy, (bs, sample_num, length, 2), jnp.float32,
                            -1.0, 1.0)

    params = init_params(k_par, feature_dim=32)
    out = spener_forward(params, img, xy)
    out = jax.block_until_ready(out)

    assert out.shape == (bs * sample_num * length, 1)
    assert bool(jnp.all(jnp.isfinite(out)))

    ref = _reference_forward(params, img, xy)
    rel = float(jnp.linalg.norm(out - ref) / (jnp.linalg.norm(ref) + 1e-8))
    # bf16 operands end-to-end (conv + gather + MLP) -> a few 1e-3 .. 1e-2 rel L2
    assert rel < 0.05, f"kernel/reference mismatch: rel L2 = {rel}"
    print("KERNEL_OK")
</pallas_src>

<mosaic_0001>
module attributes {stable_mosaic.version = 11 : i64} {
  func.func @_encoder_kernel(%arg0: i32, %arg1: memref<1x180x9xbf16, #tpu.memory_space<vmem>>, %arg2: memref<1x180x1xf32, #tpu.memory_space<vmem>>, %arg3: memref<9x48xbf16, #tpu.memory_space<vmem>>, %arg4: memref<1x48xf32, #tpu.memory_space<vmem>>, %arg5: memref<9x48x32xbf16, #tpu.memory_space<vmem>>, %arg6: memref<1x32xf32, #tpu.memory_space<vmem>>, %arg7: memref<144x32xf32, #tpu.memory_space<vmem>>, %arg8: memref<188x48xbf16, #tpu.memory_space<vmem>>) attributes {dimension_semantics = [#tpu.dimension_semantics<parallel>], iteration_bounds = array<i64: 2>, scalar_prefetch = 0 : i64, scratch_operands = 1 : i64, tpu.core_type = #tpu.core_type<tc>, window_params = [{transform_indices = @transform_0, window_bounds = array<i64: 1, 180, 9>}, {transform_indices = @transform_1, window_bounds = array<i64: 1, 180, 1>}, {pipeline_mode = #tpu.pipeline_mode<synchronous>, transform_indices = @transform_2, window_bounds = array<i64: 9, 48>}, {pipeline_mode = #tpu.pipeline_mode<synchronous>, transform_indices = @transform_3, window_bounds = array<i64: 1, 48>}, {pipeline_mode = #tpu.pipeline_mode<synchronous>, transform_indices = @transform_4, window_bounds = array<i64: 9, 48, 32>}, {pipeline_mode = #tpu.pipeline_mode<synchronous>, transform_indices = @transform_5, window_bounds = array<i64: 1, 32>}, {transform_indices = @transform_6, window_bounds = array<i64: 144, 32>}]} {
    %c0 = arith.constant 0 : index
    %c0_0 = arith.constant 0 : index
    %c0_1 = arith.constant 0 : index
    %0 = vector.load %arg1[%c0, %c0_0, %c0_1] : memref<1x180x9xbf16, #tpu.memory_space<vmem>>, vector<1x180x9xbf16>
    %1 = vector.shape_cast %0 : vector<1x180x9xbf16> to vector<180x9xbf16>
    %c0_2 = arith.constant 0 : index
    %c0_3 = arith.constant 0 : index
    %2 = vector.load %arg3[%c0_2, %c0_3] : memref<9x48xbf16, #tpu.memory_space<vmem>>, vector<9x48xbf16>
    %cst = arith.constant dense<0.000000e+00> : vector<180x48xf32>
    %3 = tpu.matmul %1, %2, %cst {dimension_numbers = #tpu.dot_dimension_numbers<[1], [0], [0], [1], [0, 0, 1, 1], [], []>} : vector<180x9xbf16>, vector<9x48xbf16>, vector<180x48xf32> -> vector<180x48xf32>
    %c0_4 = arith.constant 0 : index
    %c0_5 = arith.constant 0 : index
    %4 = vector.load %arg4[%c0_4, %c0_5] : memref<1x48xf32, #tpu.memory_space<vmem>>, vector<1x48xf32>
    %5 = vector.broadcast %4 : vector<1x48xf32> to vector<180x48xf32>
    %6 = arith.addf %3, %5 : vector<180x48xf32>
    %cst_6 = arith.constant 0.000000e+00 : f32
    %7 = vector.broadcast %cst_6 : f32 to vector<180x48xf32>
    %8 = arith.maximumf %6, %7 : vector<180x48xf32>
    %c0_7 = arith.constant 0 : index
    %c0_8 = arith.constant 0 : index
    %c0_9 = arith.constant 0 : index
    %9 = vector.load %arg2[%c0_7, %c0_8, %c0_9] : memref<1x180x1xf32, #tpu.memory_space<vmem>>, vector<1x180x1xf32>
    %10 = vector.shape_cast %9 : vector<1x180x1xf32> to vector<180x1xf32>
    %11 = vector.broadcast %10 : vector<180x1xf32> to vector<180x48xf32>
    %12 = arith.mulf %8, %11 : vector<180x48xf32>
    %13 = arith.truncf %12 : vector<180x48xf32> to vector<180x48xbf16>
    %c0_10 = arith.constant 0 : index
    %c0_11 = arith.constant 0 : index
    %14 = vector.load %arg8[%c0_10, %c0_11] : memref<188x48xbf16, #tpu.memory_space<vmem>>, vector<180x48xbf16>
    tpu.vector_store %arg8[%c0_10, %c0_11], %13 {strides = array<i32>} : memref<188x48xbf16, #tpu.memory_space<vmem>>, vector<180x48xbf16>,
    %cst_12 = arith.constant 0.000000e+00 : bf16
    %15 = vector.broadcast %cst_12 : bf16 to vector<8x48xbf16>
    %c180 = arith.constant 180 : index
    %c0_13 = arith.constant 0 : index
    %16 = vector.load %arg8[%c180, %c0_13] : memref<188x48xbf16, #tpu.memory_space<vmem>>, vector<8x48xbf16>
    tpu.vector_store %arg8[%c180, %c0_13], %15 {strides = array<i32>} : memref<188x48xbf16, #tpu.memory_space<vmem>>, vector<8x48xbf16>,
    %cst_14 = arith.constant 0.000000e+00 : f32
    %17 = vector.broadcast %cst_14 : f32 to vector<144x32xf32>
    %c0_15 = arith.constant 0 : index
    %c0_16 = arith.constant 0 : index
    %18 = vector.load %arg8[%c0_15, %c0_16] : memref<188x48xbf16, #tpu.memory_space<vmem>>, vector<144x48xbf16>
    %c0_17 = arith.constant 0 : index
    %c0_18 = arith.constant 0 : index
    %c0_19 = arith.constant 0 : index
    %19 = vector.load %arg5[%c0_17, %c0_18, %c0_19] : memref<9x48x32xbf16, #tpu.memory_space<vmem>>, vector<1x48x32xbf16>
    %20 = vector.shape_cast %19 : vector<1x48x32xbf16> to vector<48x32xbf16>
    %cst_20 = arith.constant dense<0.000000e+00> : vector<144x32xf32>
    %21 = tpu.matmul %18, %20, %cst_20 {dimension_numbers = #tpu.dot_dimension_numbers<[1], [0], [0], [1], [0, 0, 1, 1], [], []>} : vector<144x48xbf16>, vector<48x32xbf16>, vector<144x32xf32> -> vector<144x32xf32>
    %22 = arith.addf %17, %21 : vector<144x32xf32>
    %c1 = arith.constant 1 : index
    %c0_21 = arith.constant 0 : index
    %23 = vector.load %arg8[%c1, %c0_21] : memref<188x48xbf16, #tpu.memory_space<vmem>>, vector<144x48xbf16>
    %c1_22 = arith.constant 1 : index
    %c0_23 = arith.constant 0 : index
    %c0_24 = arith.constant 0 : index
    %24 = vector.load %arg5[%c1_22, %c0_23, %c0_24] : memref<9x48x32xbf16, #tpu.memory_space<vmem>>, vector<1x48x32xbf16>
    %25 = vector.shape_cast %24 : vector<1x48x32xbf16> to vector<48x32xbf16>
    %cst_25 = arith.constant dense<0.000000e+00> : vector<144x32xf32>
    %26 = tpu.matmul %23, %25, %cst_25 {dimension_numbers = #tpu.dot_dimension_numbers<[1], [0], [0], [1], [0, 0, 1, 1], [], []>} : vector<144x48xbf16>, vector<48x32xbf16>, vector<144x32xf32> -> vector<144x32xf32>
    %27 = arith.addf %22, %26 : vector<144x32xf32>
    %c2 = arith.constant 2 : index
    %c0_26 = arith.constant 0 : index
    %28 = vector.load %arg8[%c2, %c0_26] : memref<188x48xbf16, #tpu.memory_space<vmem>>, vector<144x48xbf16>
    %c2_27 = arith.constant 2 : index
    %c0_28 = arith.constant 0 : index
    %c0_29 = arith.constant 0 : index
    %29 = vector.load %arg5[%c2_27, %c0_28, %c0_29] : memref<9x48x32xbf16, #tpu.memory_space<vmem>>, vector<1x48x32xbf16>
    %30 = vector.shape_cast %29 : vector<1x48x32xbf16> to vector<48x32xbf16>
    %cst_30 = arith.constant dense<0.000000e+00> : vector<144x32xf32>
    %31 = tpu.matmul %28, %30, %cst_30 {dimension_numbers = #tpu.dot_dimension_numbers<[1], [0], [0], [1], [0, 0, 1, 1], [], []>} : vector<144x48xbf16>, vector<48x32xbf16>, vector<144x32xf32> -> vector<144x32xf32>
    %32 = arith.addf %27, %31 : vector<144x32xf32>
    %c18 = arith.constant 18 : index
    %c0_31 = arith.constant 0 : index
    %33 = vector.load %arg8[%c18, %c0_31] : memref<188x48xbf16, #tpu.memory_space<vmem>>, vector<144x48xbf16>
    %c3 = arith.constant 3 : index
    %c0_32 = arith.constant 0 : index
    %c0_33 = arith.constant 0 : index
    %34 = vector.load %arg5[%c3, %c0_32, %c0_33] : memref<9x48x32xbf16, #tpu.memory_space<vmem>>, vector<1x48x32xbf16>
    %35 = vector.shape_cast %34 : vector<1x48x32xbf16> to vector<48x32xbf16>
    %cst_34 = arith.constant dense<0.000000e+00> : vector<144x32xf32>
    %36 = tpu.matmul %33, %35, %cst_34 {dimension_numbers = #tpu.dot_dimension_numbers<[1], [0], [0], [1], [0, 0, 1, 1], [], []>} : vector<144x48xbf16>, vector<48x32xbf16>, vector<144x32xf32> -> vector<144x32xf32>
    %37 = arith.addf %32, %36 : vector<144x32xf32>
    %c19 = arith.constant 19 : index
    %c0_35 = arith.constant 0 : index
    %38 = vector.load %arg8[%c19, %c0_35] : memref<188x48xbf16, #tpu.memory_space<vmem>>, vector<144x48xbf16>
    %c4 = arith.constant 4 : index
    %c0_36 = arith.constant 0 : index
    %c0_37 = arith.constant 0 : index
    %39 = vector.load %arg5[%c4, %c0_36, %c0_37] : memref<9x48x32xbf16, #tpu.memory_space<vmem>>, vector<1x48x32xbf16>
    %40 = vector.shape_cast %39 : vector<1x48x32xbf16> to vector<48x32xbf16>
    %cst_38 = arith.constant dense<0.000000e+00> : vector<144x32xf32>
    %41 = tpu.matmul %38, %40, %cst_38 {dimension_numbers = #tpu.dot_dimension_numbers<[1], [0], [0], [1], [0, 0, 1, 1], [], []>} : vector<144x48xbf16>, vector<48x32xbf16>, vector<144x32xf32> -> vector<144x32xf32>
    %42 = arith.addf %37, %41 : vector<144x32xf32>
    %c20 = arith.constant 20 : index
    %c0_39 = arith.constant 0 : index
    %43 = vector.load %arg8[%c20, %c0_39] : memref<188x48xbf16, #tpu.memory_space<vmem>>, vector<144x48xbf16>
    %c5 = arith.constant 5 : index
    %c0_40 = arith.constant 0 : index
    %c0_41 = arith.constant 0 : index
    %44 = vector.load %arg5[%c5, %c0_40, %c0_41] : memref<9x48x32xbf16, #tpu.memory_space<vmem>>, vector<1x48x32xbf16>
    %45 = vector.shape_cast %44 : vector<1x48x32xbf16> to vector<48x32xbf16>
    %cst_42 = arith.constant dense<0.000000e+00> : vector<144x32xf32>
    %46 = tpu.matmul %43, %45, %cst_42 {dimension_numbers = #tpu.dot_dimension_numbers<[1], [0], [0], [1], [0, 0, 1, 1], [], []>} : vector<144x48xbf16>, vector<48x32xbf16>, vector<144x32xf32> -> vector<144x32xf32>
    %47 = arith.addf %42, %46 : vector<144x32xf32>
    %c36 = arith.constant 36 : index
    %c0_43 = arith.constant 0 : index
    %48 = vector.load %arg8[%c36, %c0_43] : memref<188x48xbf16, #tpu.memory_space<vmem>>, vector<144x48xbf16>
    %c6 = arith.constant 6 : index
    %c0_44 = arith.constant 0 : index
    %c0_45 = arith.constant 0 : index
    %49 = vector.load %arg5[%c6, %c0_44, %c0_45] : memref<9x48x32xbf16, #tpu.memory_space<vmem>>, vector<1x48x32xbf16>
    %50 = vector.shape_cast %49 : vector<1x48x32xbf16> to vector<48x32xbf16>
    %cst_46 = arith.constant dense<0.000000e+00> : vector<144x32xf32>
    %51 = tpu.matmul %48, %50, %cst_46 {dimension_numbers = #tpu.dot_dimension_numbers<[1], [0], [0], [1], [0, 0, 1, 1], [], []>} : vector<144x48xbf16>, vector<48x32xbf16>, vector<144x32xf32> -> vector<144x32xf32>
    %52 = arith.addf %47, %51 : vector<144x32xf32>
    %c37 = arith.constant 37 : index
    %c0_47 = arith.constant 0 : index
    %53 = vector.load %arg8[%c37, %c0_47] : memref<188x48xbf16, #tpu.memory_space<vmem>>, vector<144x48xbf16>
    %c7 = arith.constant 7 : index
    %c0_48 = arith.constant 0 : index
    %c0_49 = arith.constant 0 : index
    %54 = vector.load %arg5[%c7, %c0_48, %c0_49] : memref<9x48x32xbf16, #tpu.memory_space<vmem>>, vector<1x48x32xbf16>
    %55 = vector.shape_cast %54 : vector<1x48x32xbf16> to vector<48x32xbf16>
    %cst_50 = arith.constant dense<0.000000e+00> : vector<144x32xf32>
    %56 = tpu.matmul %53, %55, %cst_50 {dimension_numbers = #tpu.dot_dimension_numbers<[1], [0], [0], [1], [0, 0, 1, 1], [], []>} : vector<144x48xbf16>, vector<48x32xbf16>, vector<144x32xf32> -> vector<144x32xf32>
    %57 = arith.addf %52, %56 : vector<144x32xf32>
    %c38 = arith.constant 38 : index
    %c0_51 = arith.constant 0 : index
    %58 = vector.load %arg8[%c38, %c0_51] : memref<188x48xbf16, #tpu.memory_space<vmem>>, vector<144x48xbf16>
    %c8 = arith.constant 8 : index
    %c0_52 = arith.constant 0 : index
    %c0_53 = arith.constant 0 : index
    %59 = vector.load %arg5[%c8, %c0_52, %c0_53] : memref<9x48x32xbf16, #tpu.memory_space<vmem>>, vector<1x48x32xbf16>
    %60 = vector.shape_cast %59 : vector<1x48x32xbf16> to vector<48x32xbf16>
    %cst_54 = arith.constant dense<0.000000e+00> : vector<144x32xf32>
    %61 = tpu.matmul %58, %60, %cst_54 {dimension_numbers = #tpu.dot_dimension_numbers<[1], [0], [0], [1], [0, 0, 1, 1], [], []>} : vector<144x48xbf16>, vector<48x32xbf16>, vector<144x32xf32> -> vector<144x32xf32>
    %62 = arith.addf %57, %61 : vector<144x32xf32>
    %c0_55 = arith.constant 0 : index
    %c0_56 = arith.constant 0 : index
    %63 = vector.load %arg6[%c0_55, %c0_56] : memref<1x32xf32, #tpu.memory_space<vmem>>, vector<1x32xf32>
    %64 = vector.broadcast %63 : vector<1x32xf32> to vector<144x32xf32>
    %65 = arith.addf %62, %64 : vector<144x32xf32>
    %c0_57 = arith.constant 0 : index
    %c0_58 = arith.constant 0 : index
    %66 = vector.load %arg7[%c0_57, %c0_58] : memref<144x32xf32, #tpu.memory_space<vmem>>, vector<144x32xf32>
    tpu.vector_store %arg7[%c0_57, %c0_58], %65 {strides = array<i32>} : memref<144x32xf32, #tpu.memory_space<vmem>>, vector<144x32xf32>,
    return
  }
  func.func @transform_0(%arg0: i32) -> (i32, i32, i32) {
    %c0_i32 = arith.constant 0 : i32
    %c0_i32_0 = arith.constant 0 : i32
    %c0_i32_1 = arith.constant 0 : i32
    return %arg0, %c0_i32, %c0_i32_0 : i32, i32, i32
  }
  func.func @transform_1(%arg0: i32) -> (i32, i32, i32) {
    %c0_i32 = arith.constant 0 : i32
    %c0_i32_0 = arith.constant 0 : i32
    %c0_i32_1 = arith.constant 0 : i32
    return %arg0, %c0_i32, %c0_i32_0 : i32, i32, i32
  }
  func.func @transform_2(%arg0: i32) -> (i32, i32) {
    %c0_i32 = arith.constant 0 : i32
    %c0_i32_0 = arith.constant 0 : i32
    %c0_i32_1 = arith.constant 0 : i32
    return %c0_i32, %c0_i32_0 : i32, i32
  }
  func.func @transform_3(%arg0: i32) -> (i32, i32) {
    %c0_i32 = arith.constant 0 : i32
    %c0_i32_0 = arith.constant 0 : i32
    %c0_i32_1 = arith.constant 0 : i32
    return %c0_i32, %c0_i32_0 : i32, i32
  }
  func.func @transform_4(%arg0: i32) -> (i32, i32, i32) {
    %c0_i32 = arith.constant 0 : i32
    %c0_i32_0 = arith.constant 0 : i32
    %c0_i32_1 = arith.constant 0 : i32
    %c0_i32_2 = arith.constant 0 : i32
    return %c0_i32, %c0_i32_0, %c0_i32_1 : i32, i32, i32
  }
  func.func @transform_5(%arg0: i32) -> (i32, i32) {
    %c0_i32 = arith.constant 0 : i32
    %c0_i32_0 = arith.constant 0 : i32
    %c0_i32_1 = arith.constant 0 : i32
    return %c0_i32, %c0_i32_0 : i32, i32
  }
  func.func @transform_6(%arg0: i32) -> (i32, i32) {
    %c0_i32 = arith.constant 0 : i32
    %c0_i32_0 = arith.constant 0 : i32
    return %arg0, %c0_i32 : i32, i32
  }
}

</mosaic_0001>

<bundles_post_ra>
// kernel: tpu_custom_call.1
= control target key start
LH: loop header
LB: loop body
LE: loop exit
PB: predicated region body
PF: predicated region fallthrough
CT: control target
= control target key end

     0   :  { %s3010_s21 = smov 0   ;;  %s3867_s0 = inlined_call_operand.vmem [shape: bf16[2,180,9], index: 0, kind: input, shape index: {}]   ;;  %s3868_s1 = inlined_call_operand.vmem [shape: f32[2,180,1], index: 1, kind: input, shape index: {}]   ;;  %s3869_s2 = inlined_call_operand.vmem [shape: bf16[9,48], index: 2, kind: input, shape index: {}]   ;;  %s3870_s3 = inlined_call_operand.vmem [shape: f32[1,48], index: 3, kind: input, shape index: {}]   ;;  %s3871_s4 = inlined_call_operand.vmem [shape: bf16[9,48,32], index: 4, kind: input, shape index: {}]   ;;  %s3872_s5 = inlined_call_operand.vmem [shape: f32[1,32], index: 5, kind: input, shape index: {}]   ;;  %s3873_s6 = inlined_call_operand.vmem [shape: f32[288,32], index: 6, kind: output, shape index: {}]  }
   0x1 LB: > { %s3016_s22 = sadd.s32 4294967295, %s2971_s21   ;;  %p2473_p0 = scmp.ge.s32.totalorder %s2971_s21, 1  ;;  %s2971_s21 = sphi %s3010_s21, %s16_s21  }
   0x2   : > { %p222_p1 = scmp.lt.s32.totalorder %s2971_s21, 3 }
   0x4   : > { %p223_p2 = pnand %p2473_p0, %p222_p1 }
   0x6   : > { %226 = sbr.rel (%p223_p2) target bundleno = 758 (0x2f6), region = 44 }
   0xb   : > { %v2523_v0 = vld [vmem:[%s3869_s2] sm:$0xf]  ;;  %v2883_v1 = vld [vmem:[%s3869_s2] sm:$0x10]  ;;  %vm403_vm0 = vcmask 1043456   ;;  %vm404_vm1 = vcmask 1044480  }
   0xc   : > { %v2524_v2 = vor.u32 %v2883_v1, %v2523_v0  ;;  %p257_p3 = scmp.lt.s32.totalorder %s3016_s22, 1  ;;  %v2973_v3 = vmov 65535   ;;  %vm710_vm2 = vcmask 388098   ;;  %v2974_v5 = vmov 0   ;;  %v3081_v39 = vld [vmem:[%s3870_s3] ss:$0 sm:$0xff] }
   0xd   : > { %v405_v4 = vsel %vm403_vm0, 4294967295, %v2973_v3  ;;  %2960 = vset.pattern.permute.xlu0 %v2974_v5  ;;  %2961 = vset.pattern.permute.xlu1 %v2974_v5  ;;  %711 = vst.msk [vmem:[#allocation2 + $0x58] sm:$0xc] %vm710_vm2, %v2974_v5  ;;  %vm366_vm3 = vcmask 72704   ;;  %v2897_v44 = vld [vmem:[%s3871_s4 + $0x28] sm:$0xff]  ;;  %vm685_vm4 = vcmask 388096  }
   0xe   : > { %v406_v6 = vsel %vm404_vm1, %v405_v4, 0  ;;  %s258_s27 = scalar_select %p257_p3, %s3016_s22, 1  ;;  %2962 = vset.pattern.permute.xlu2 %v2974_v5  ;;  %921 = vmatpush.bf16.msra.mxu1 %v2897_v44  ;;  %v2896_v47 = vld [vmem:[%s3871_s4 + $0x20] sm:$0xff]  ;;  %v2895_v52 = vld [vmem:[%s3871_s4 + $0x18] sm:$0xff]  ;;  %v2894_v62 = vld [vmem:[%s3871_s4 + $0x10] sm:$0xff]  ;;  %vm888_vm6 = vcmask 392192  }
   0xf   : > { %v408_v7 = vand.u32 %v2524_v2, %v406_v6  ;;  %2942 = vmatpush.bf16.msra.mxu3 %v2897_v44  ;;  %2945 = vmatpush.bf16.msra.mxu2 %v2894_v62  ;;  %v2893_v3 = vld [vmem:[%s3871_s4 + $0x8] sm:$0xff]  ;;  %v2892_v6 = vld [vmem:[%s3871_s4] sm:$0xff]  ;;  %vm793_vm5 = vsmask.f32 7424  ;;  %vm1071_vm7 = vcmask 1046528   ;;  %vm1647_vm8 = vcmask 1045504  }
  0x10   : > { %s2948_s28 = smul.u32 92, %s258_s27  ;;  %vm2005_vm9 = vsmask.f32 5376  ;;  %vm708_vm10 = vcmask 386048   ;;  %vm1429_vm11 = vsmask.f32 6400 }
  0x11   : > { %417 = vmatpush.bf16.msra.mxu0 %v408_v7  ;;  %s2949_s29 = smul.u32 184, %s258_s27  ;;  %vm2382_vm12 = vcmask 261120  }
  0x12   : > { %s3032_s8 = scalar_lea.vmem %s3867_s0, %s2948_s28  ;;  %922 = vmatpush.bf16.msra.mxu1 %v2896_v47  ;;  %s267_s26 = smul.u32 18, %s3016_s22 }
  0x13   : > { %v2872_v8 = vld [vmem:[%s3032_s8] sm:$0xff]  ;;  %s3038_s11 = scalar_lea.vmem %s3868_s1, %s2949_s29  ;;  %v2873_v13 = vld [vmem:[%s3032_s8 + $0x8] sm:$0xff]  ;;  %v2874_v18 = vld [vmem:[%s3032_s8 + $0x10] sm:$0xff]  ;;  %2943 = vmatpush.bf16.msra.mxu3 %v2896_v47  ;;  %2946 = vmatpush.bf16.msra.mxu2 %v2893_v3 }
  0x14   : > { %v501_v9 = vld [vmem:[%s3038_s11] sm:$0xff]  ;;  %v503_v10 = vld [vmem:[%s3038_s11 + $0x10] sm:$0xff]  ;;  %2525 = vmatmul.msk.bf16.vlgmr.msra.gmra.mxu0 %vm366_vm3, %v2872_v8  ;;  %v502_v11 = vld [vmem:[%s3038_s11 + $0x8] sm:$0xff]  ;;  %p268_p4 = scmp.lt.s32.totalorder %s267_s26, 35 }
  0x15   : > { %526 = vperm.xlu0 %2960, %v501_v9   ;;  %536 = vperm.xlu1 %2961, %v503_v10   ;;  %v504_v12 = vld [vmem:[%s3038_s11 + $0x18] sm:$0xff]  ;;  %v505_v14 = vld [vmem:[%s3038_s11 + $0x20] sm:$0xff]  ;;  %v506_v15 = vld [vmem:[%s3038_s11 + $0x28] sm:$0xff] }
  0x16   : > { %v510_v16 = vld [vmem:[%s3038_s11 + $0x48] sm:$0xff]  ;;  %v511_v17 = vld [vmem:[%s3038_s11 + $0x50] sm:$0xff]  ;;  %v513_v19 = vld [vmem:[%s3038_s11 + $0x60] sm:$0xff]  ;;  %923 = vmatpush.bf16.msra.mxu1 %v2895_v52  ;;  %1011 = vmatpush.bf16.msrb.mxu0 %v2894_v62  ;;  %s3891_s26 = smov (!%p268_p4, %s267_s26), 35 }
  0x17   : > { %v514_v20 = vld [vmem:[%s3038_s11 + $0x68] sm:$0xff]  ;;  %v507_v21 = vld [vmem:[%s3038_s11 + $0x30] sm:$0xff]  ;;  %v516_v22 = vld [vmem:[%s3038_s11 + $0x78] sm:$0xff]  ;;  %2944 = vmatpush.bf16.msra.mxu3 %v2895_v52  ;;  %2947 = vmatpush.bf16.msra.mxu2 %v2892_v6  ;;  %s2476_s27 = sshll.u32 %s3891_s26, 3 }
  0x18   : > { %556 = vperm.xlu2 %2962, %v507_v21   ;;  %v517_v23 = vld [vmem:[%s3038_s11 + $0x80] sm:$0xff]  ;;  %v508_v24 = vld [vmem:[%s3038_s11 + $0x38] sm:$0xff]  ;;  %v519_v26 = vld [vmem:[%s3038_s11 + $0x90] sm:$0xff]  ;;  %s3791_s7 = scalar_lea.vmem %s3873_s6, %s2476_s27 }
  0x19   : > { %v2875_v25 = vld [vmem:[%s3032_s8 + $0x18] sm:$0xff]  ;;  %v509_v28 = vld [vmem:[%s3038_s11 + $0x40] sm:$0xff]  ;;  %v522_v29 = vld [vmem:[%s3038_s11 + $0xa8] sm:$0xff] }
  0x1a   : > { %v520_v27 = vld [vmem:[%s3038_s11 + $0x98] sm:$0xff]  ;;  %v523_v30 = vld [vmem:[%s3038_s11 + $0xb0] sm:$0xf]  ;;  %v2876_v32 = vld [vmem:[%s3032_s8 + $0x20] sm:$0xff]  ;;  %1012 = vmatpush.bf16.msrb.mxu0 %v2893_v3 }
  0x1b   : > { %v512_v31 = vld [vmem:[%s3038_s11 + $0x58] sm:$0xff]  ;;  %v515_v33 = vld [vmem:[%s3038_s11 + $0x70] sm:$0xff]  ;;  %v518_v34 = vld [vmem:[%s3038_s11 + $0x88] sm:$0xff] }
  0x1c   : > { %v2877_v35 = vld [vmem:[%s3032_s8 + $0x28] sm:$0xff]  ;;  %v521_v36 = vld [vmem:[%s3038_s11 + $0xa0] sm:$0xff]  ;;  %v2878_v37 = vld [vmem:[%s3032_s8 + $0x30] sm:$0xff] }
  0x1d   : > { %531 = vperm.xlu0 %2960, %v502_v11   ;;  %541 = vperm.xlu1 %2961, %v504_v12   ;;  %v2879_v38 = vld [vmem:[%s3032_s8 + $0x38] sm:$0xff]  ;;  %v2880_v40 = vld [vmem:[%s3032_s8 + $0x40] sm:$0xff]  ;;  %v2881_v56 = vld [vmem:[%s3032_s8 + $0x48] sm:$0xff] }
  0x1e   : > { %v2882_v8 = vld [vmem:[%s3032_s8 + $0x50] sm:$0xff]  ;;  %1013 = vmatpush.bf16.msrb.mxu0 %v2892_v6 }
  0x20   : > { %561 = vperm.xlu2 %2962, %v508_v24  }
  0x24   : > { %2526 = vmatmul.msk.bf16.gmra.mxu0 %vm366_vm3, %v2873_v13 }
  0x25   : > { %546 = vperm.xlu0 %2960, %v505_v14   ;;  %551 = vperm.xlu1 %2961, %v506_v15  }
  0x28   : > { %566 = vperm.xlu2 %2962, %v509_v28  }
  0x2d   : > { %571 = vperm.xlu0 %2960, %v510_v16   ;;  %576 = vperm.xlu1 %2961, %v511_v17  }
  0x30   : > { %581 = vperm.xlu2 %2962, %v512_v31  }
  0x34   : > { %2527 = vmatmul.msk.bf16.gmra.mxu0 %vm366_vm3, %v2874_v18 }
  0x35   : > { %586 = vperm.xlu0 %2960, %v513_v19   ;;  %591 = vperm.xlu1 %2961, %v514_v20   ;;  %v296_v20 = vld [vmem:[%s3032_s8 + $0x58] sm:$0x3] }
  0x38   : > { %596 = vperm.xlu2 %2962, %v515_v33  }
  0x3d   : > { %601 = vperm.xlu0 %2960, %v516_v22   ;;  %606 = vperm.xlu1 %2961, %v517_v23  }
  0x40   : > { %611 = vperm.xlu2 %2962, %v518_v34  }
  0x44   : > { %2528 = vmatmul.msk.bf16.gmra.mxu0 %vm366_vm3, %v2875_v25  ;;  %v348_v25 = vunpack.c.l.b16 %v296_v20 }
  0x45   : > { %616 = vperm.xlu0 %2960, %v519_v26   ;;  %621 = vperm.xlu1 %2961, %v520_v27  }
  0x48   : > { %626 = vperm.xlu2 %2962, %v521_v36  }
  0x4d   : > { %631 = vperm.xlu0 %2960, %v522_v29   ;;  %636 = vperm.xlu1 %2961, %v523_v30  }
  0x54   : > { %2529 = vmatmul.msk.bf16.gmra.mxu0 %vm366_vm3, %v2876_v32  ;;  %v360_v32 = vpack.c.b16 %v348_v25, %v348_v25 }
  0x64   : > { %2530 = vmatmul.msk.bf16.gmra.mxu0 %vm366_vm3, %v2877_v35 }
  0x72   : > { %v557_v33 = vpop.permute.xlu2 %556 }
  0x74   : > { %2531 = vmatmul.msk.bf16.gmra.mxu0 %vm366_vm3, %v2878_v37 }
  0x7a   : > { %v562_v47 = vpop.permute.xlu2 %561 }
  0x84   : > { %2532 = vmatmul.msk.bf16.gmra.mxu0 %vm366_vm3, %v2879_v38 }
  0x87   : > { %v527_v42 = vpop.permute.xlu0 %526  ;;  %v537_v58 = vpop.permute.xlu1 %536 }
  0x8f   : > { %v532_v51 = vpop.permute.xlu0 %531  ;;  %v542_v2 = vpop.permute.xlu1 %541 }
  0x91   : > { %v419_v41 = vpop.f32.mrf.mxu0 }
  0x92   : > { %v420_v43 = vadd.f32 %v3081_v39, %v419_v41 }
  0x94   : > { %v478_v45 = vmax.f32 %v420_v43, 0.0  ;;  %2533 = vmatmul.msk.bf16.gmra.mxu0 %vm366_vm3, %v2880_v40 }
  0x96   : > { %v639_v46 = vmul.f32 %v527_v42, %v478_v45 }
  0x97   : > { %v547_v12 = vpop.permute.xlu0 %546  ;;  %v552_v26 = vpop.permute.xlu1 %551 }
  0x98   : > { %v662_v48 = vpack.c.bf16 %v639_v46, %v639_v46 }
  0x99   : > { %v421_v49 = vpop.f32.mrf.mxu0 }
  0x9a   : > { %686 = vst.msk [vmem:[#allocation2] sm:$0xf] %vm685_vm4, %v662_v48  ;;  %v422_v50 = vadd.f32 %v3081_v39, %v421_v49 }
  0x9c   : > { %v479_v53 = vmax.f32 %v422_v50, 0.0 }
  0x9e   : > { %v640_v54 = vmul.f32 %v532_v51, %v479_v53 }
  0xa0   : > { %v663_v55 = vpack.c.bf16 %v640_v54, %v640_v54 }
  0xa1   : > { %v424_v57 = vpop.f32.mrf.mxu0 }
  0xa2   : > { %687 = vst.msk [vmem:[#allocation2 + $0x4] sm:$0xf] %vm685_vm4, %v663_v55  ;;  %v425_v59 = vadd.f32 %v3081_v39, %v424_v57 }
  0xa4   : > { %v480_v60 = vmax.f32 %v425_v59, 0.0  ;;  %2534 = vmatmul.msk.bf16.gmra.mxu0 %vm366_vm3, %v2881_v56 }
  0xa6   : > { %v641_v61 = vmul.f32 %v537_v58, %v480_v60 }
  0xa8   : > { %v664_v63 = vpack.c.bf16 %v641_v61, %v641_v61 }
  0xa9   : > { %v426_v0 = vpop.f32.mrf.mxu0  ;;  %v3115_v11 = vld [vmem:[#allocation2] sm:$0xff]  }
  0xaa   : > { %688 = vst.msk [vmem:[#allocation2 + $0x8] sm:$0xf] %vm685_vm4, %v664_v63  ;;  %v427_v1 = vadd.f32 %v3081_v39, %v426_v0  ;;  %v797_v14 = vshll.u32 %v3115_v11, 16  ;;  %v795_v22 = vshrl.u32 %v3115_v11, 16 }
  0xac   : > { %v481_v4 = vmax.f32 %v427_v1, 0.0  ;;  %v799_v19 = vrot.slane %v797_v14, 1 }
  0xae   : > { %v642_v5 = vmul.f32 %v542_v2, %v481_v4  ;;  %v800_v27 = vor.u32 %v799_v19, %v795_v22 }
  0xb0   : > { %v665_v7 = vpack.c.bf16 %v642_v5, %v642_v5 }
  0xb1   : > { %v429_v9 = vpop.f32.mrf.mxu0  ;;  %v1636_v40 = vld [vmem:[#allocation2 + $0x8] sm:$0xc] }
  0xb2   : > { %689 = vst.msk [vmem:[#allocation2 + $0xc] sm:$0xf] %vm685_vm4, %v665_v7  ;;  %v430_v10 = vadd.f32 %v3081_v39, %v429_v9  ;;  %v1645_v46 = vunpack.c.l.b16 %v1636_v40  ;;  %v567_v7 = vpop.permute.xlu2 %566 }
  0xb4   : > { %v482_v13 = vmax.f32 %v430_v10, 0.0  ;;  %2535 = vmatmul.msk.bf16.gmra.mxu0 %vm366_vm3, %v2882_v8  ;;  %v2928_v10 = vld [vmem:[%s3871_s4 + $0xa0] sm:$0xff] }
  0xb5   : > { %1927 = vmatpush.bf16.msra.mxu0 %v2928_v10 }
  0xb6   : > { %v643_v15 = vmul.f32 %v547_v12, %v482_v13 }
  0xb8   : > { %v666_v16 = vpack.c.bf16 %v643_v15, %v643_v15 }
  0xb9   : > { %v431_v17 = vpop.f32.mrf.mxu0  ;;  %v3119_v18 = vld [vmem:[#allocation2 + $0x8] sm:$0xff] }
  0xba   : > { %690 = vst.msk [vmem:[#allocation2 + $0x10] sm:$0xf] %vm685_vm4, %v666_v16  ;;  %v432_v21 = vadd.f32 %v3081_v39, %v431_v17  ;;  %v802_v23 = vshll.u32 %v3119_v18, 16  ;;  %v3131_v37 = vld [vmem:[#allocation2 + $0xc] sm:$0xf]  ;;  %v806_v48 = vshrl.u32 %v3119_v18, 16 }
  0xbb   : > { %v1254_v42 = vunpack.c.l.b16 %v3131_v37  ;;  %v3874_v52 = vrot.slane %v3119_v18, 1  ;;  %v2914_v17 = vld [vmem:[%s3871_s4 + $0x70] sm:$0xff] }
  0xbc   : > { %v483_v24 = vmax.f32 %v432_v21, 0.0  ;;  %v804_v28 = vrot.slane %v802_v23, 1  ;;  %v2927_v23 = vld [vmem:[%s3871_s4 + $0x98] sm:$0xff]  ;;  %1569 = vmatpush.bf16.msrb.mxu2 %v2914_v17 }
  0xbd   : > { %v1646_v54 = vpack.c.b16 %v1254_v42, %v1645_v46  ;;  %1928 = vmatpush.bf16.msra.mxu0 %v2927_v23 }
  0xbe   : > { %v644_v29 = vmul.f32 %v552_v26, %v483_v24  ;;  %v805_v30 = vsel %vm793_vm5, %v800_v27, %v804_v28  ;;  %v808_v55 = vor.u32 %v806_v48, %v804_v28 }
  0xbf   : > { %2587 = vmatmul.msk.bf16.vlgmr.msra.gmra.mxu1 %vm888_vm6, %v805_v30  ;;  %v1648_v62 = vrot.slane %v1646_v54, 2  ;;  %v2911_v54 = vld [vmem:[%s3871_s4 + $0x58] sm:$0xff] }
  0xc0   : > { %v667_v31 = vpack.c.bf16 %v644_v29, %v644_v29  ;;  %v572_v29 = vpop.permute.xlu0 %571  ;;  %1351 = vmatpush.bf16.msrb.mxu1 %v2911_v54 }
  0xc1   : > { %v434_v34 = vpop.f32.mrf.mxu0  ;;  %v1784_v1 = vld [vmem:[#allocation2 + $0x10] sm:$0xc] }
  0xc2   : > { %691 = vst.msk [vmem:[#allocation2 + $0x14] sm:$0xf] %vm685_vm4, %v667_v31  ;;  %v435_v35 = vadd.f32 %v3081_v39, %v434_v34  ;;  %v1829_v6 = vunpack.c.l.b16 %v1784_v1  ;;  %v2212_v12 = vld [vmem:[#allocation2 + $0x10] sm:$0x8] }
  0xc3   : > { %v2221_v20 = vunpack.c.l.b16 %v2212_v12 }
  0xc4   : > { %v484_v36 = vmax.f32 %v435_v35, 0.0  ;;  %2536 = vmatmul.msk.bf16.gmra.mxu0 %vm366_vm3, %v360_v32 }
  0xc6   : > { %v645_v38 = vmul.f32 %v557_v33, %v484_v36 }
  0xc8   : > { %v668_v41 = vpack.c.bf16 %v645_v38, %v645_v38  ;;  %v2926_v38 = vld [vmem:[%s3871_s4 + $0x90] sm:$0xff] }
  0xc9   : > { %v436_v43 = vpop.f32.mrf.mxu0  ;;  %v3134_v44 = vld [vmem:[#allocation2 + $0x10] sm:$0xff]  ;;  %1929 = vmatpush.bf16.msra.mxu0 %v2926_v38 }
  0xca   : > { %692 = vst.msk [vmem:[#allocation2 + $0x18] sm:$0xf] %vm685_vm4, %v668_v41  ;;  %v437_v45 = vadd.f32 %v3081_v39, %v436_v43  ;;  %v810_v49 = vshll.u32 %v3134_v44, 16  ;;  %v3140_v51 = vld [vmem:[#allocation2 + $0x10] sm:$0xff]  ;;  %v1075_v53 = vrot.slane %v3134_v44, 1  ;;  %v814_v21 = vshrl.u32 %v3134_v44, 16 }
  0xcb   : > { %v1785_v60 = vld [vmem:[#allocation2 + $0x14] sm:$0xf]  ;;  %v1649_v63 = vrot.slane %v3140_v51, 2 }
  0xcc   : > { %v485_v50 = vmax.f32 %v437_v45, 0.0  ;;  %v812_v56 = vrot.slane %v810_v49, 1  ;;  %v3149_v58 = vsel %vm1071_vm7, %v3874_v52, %v1075_v53  ;;  %v1830_v3 = vunpack.c.l.b16 %v1785_v60 }
  0xcd   : > { %v3157_v4 = vsel %vm1647_vm8, %v1648_v62, %v1649_v63 }
  0xce   : > { %v646_v57 = vmul.f32 %v562_v47, %v485_v50  ;;  %v813_v59 = vsel %vm793_vm5, %v808_v55, %v812_v56  ;;  %v3161_v9 = vpack.c.b16 %v1830_v3, %v1829_v6  ;;  %v2222_v28 = vpack.c.b16 %v1830_v3, %v2221_v20 }
  0xcf   : > { %2588 = vmatmul.msk.bf16.gmra.mxu1 %vm888_vm6, %v813_v59  ;;  %v816_v30 = vor.u32 %v814_v21, %v812_v56 }
  0xd0   : > { %v669_v61 = vpack.c.bf16 %v646_v57, %v646_v57  ;;  %v2007_v19 = vshrl.u32 %v3161_v9, 16  ;;  %v2010_v24 = vshll.u32 %v3161_v9, 16  ;;  %v2224_v46 = vrot.slane %v2222_v28, 3 }
  0xd1   : > { %v439_v0 = vpop.f32.mrf.mxu0 }
  0xd2   : > { %693 = vst.msk [vmem:[#allocation2 + $0x1c] sm:$0xf] %vm685_vm4, %v669_v61  ;;  %v440_v2 = vadd.f32 %v3081_v39, %v439_v0  ;;  %v2009_v35 = vrot.slane %v2007_v19, 2  ;;  %v2012_v40 = vrot.slane %v2010_v24, 3  ;;  %v577_v61 = vpop.permute.xlu1 %576 }
  0xd4   : > { %v486_v5 = vmax.f32 %v440_v2, 0.0  ;;  %2608 = vmatmul.msk.bf16.vlgmr.msrb.gmra.mxu0 %vm888_vm6, %v3115_v11  ;;  %v2013_v57 = vor.u32 %v2012_v40, %v2009_v35  ;;  %v587_v35 = vpop.permute.xlu0 %586  ;;  %v2910_v40 = vld [vmem:[%s3871_s4 + $0x50] sm:$0xff] }
  0xd5   : > { %1352 = vmatpush.bf16.msrb.mxu1 %v2910_v40 }
  0xd6   : > { %v647_v8 = vmul.f32 %v567_v7, %v486_v5 }
  0xd8   : > { %v670_v13 = vpack.c.bf16 %v647_v8, %v647_v8 }
  0xd9   : > { %v441_v14 = vpop.f32.mrf.mxu0  ;;  %v3166_v15 = vld [vmem:[#allocation2 + $0x18] sm:$0xff] }
  0xda   : > { %v3168_v16 = vld [vmem:[#allocation2 + $0x18] sm:$0xff]  ;;  %694 = vst.msk [vmem:[#allocation2 + $0x20] sm:$0xf] %vm685_vm4, %v670_v13  ;;  %v442_v11 = vadd.f32 %v3081_v39, %v441_v14  ;;  %2611 = vmatmul.msk.bf16.vlgmr.msra.gmra.mxu2 %vm888_vm6, %v3166_v15  ;;  %v818_v22 = vshll.u32 %v3166_v15, 16  ;;  %v1077_v27 = vrot.slane %v3166_v15, 1  ;;  %v822_v6 = vshrl.u32 %v3166_v15, 16  ;;  %v582_v13 = vpop.permute.xlu2 %581 }
  0xdb   : > { %v3184_v26 = vld [vmem:[#allocation2 + $0x18] sm:$0xff]  ;;  %v2015_v32 = vshrl.u32 %v3168_v16, 16  ;;  %v2018_v43 = vshll.u32 %v3168_v16, 16  ;;  %v2225_v47 = vrot.slane %v3168_v16, 3 }
  0xdc   : > { %v487_v25 = vmax.f32 %v442_v11, 0.0  ;;  %v820_v31 = vrot.slane %v818_v22, 1  ;;  %v3189_v34 = vsel %vm1071_vm7, %v1075_v53, %v1077_v27  ;;  %v1651_v48 = vrot.slane %v3184_v26, 2 }
  0xdd   : > { %v2017_v41 = vrot.slane %v2015_v32, 2  ;;  %v2020_v50 = vrot.slane %v2018_v43, 3  ;;  %v3205_v55 = vsel %vm404_vm1, %v2224_v46, %v2225_v47 }
  0xde   : > { %v648_v33 = vmul.f32 %v572_v29, %v487_v25  ;;  %v821_v36 = vsel %vm793_vm5, %v816_v30, %v820_v31  ;;  %v3208_v56 = vsel %vm1647_vm8, %v1649_v63, %v1651_v48  ;;  %v824_v14 = vor.u32 %v822_v6, %v820_v31 }
  0xdf   : > { %2589 = vmatmul.msk.bf16.gmra.mxu1 %vm888_vm6, %v821_v36  ;;  %v2021_v59 = vor.u32 %v2020_v50, %v2017_v41  ;;  %v2909_v50 = vld [vmem:[%s3871_s4 + $0x48] sm:$0xff] }
  0xe0   : > { %v671_v45 = vpack.c.bf16 %v648_v33, %v648_v33  ;;  %1353 = vmatpush.bf16.msrb.mxu1 %v2909_v50 }
  0xe1   : > { %v444_v49 = vpop.f32.mrf.mxu0  ;;  %v3213_v62 = vsel %vm2005_vm9, %v2013_v57, %v2021_v59 }
  0xe2   : > { %695 = vst.msk [vmem:[#allocation2 + $0x24] sm:$0xf] %vm685_vm4, %v671_v45  ;;  %v445_v53 = vadd.f32 %v3081_v39, %v444_v49 }
  0xe4   : > { %v488_v60 = vmax.f32 %v445_v53, 0.0  ;;  %2609 = vmatmul.msk.bf16.gmra.mxu0 %vm888_vm6, %v3119_v18 }
  0xe6   : > { %v649_v0 = vmul.f32 %v577_v61, %v488_v60 }
  0xe8   : > { %v672_v1 = vpack.c.bf16 %v649_v0, %v649_v0 }
  0xe9   : > { %v446_v2 = vpop.f32.mrf.mxu0  ;;  %v2887_v3 = vld [vmem:[#allocation2 + $0x20] sm:$0xff] }
  0xea   : > { %v3215_v5 = vld [vmem:[#allocation2 + $0x20] sm:$0xff]  ;;  %696 = vst.msk [vmem:[#allocation2 + $0x28] sm:$0xf] %vm685_vm4, %v672_v1  ;;  %v447_v63 = vadd.f32 %v3081_v39, %v446_v2  ;;  %2612 = vmatmul.msk.bf16.gmra.mxu2 %vm888_vm6, %v2887_v3  ;;  %v826_v7 = vshll.u32 %v2887_v3, 16  ;;  %v1079_v12 = vrot.slane %v2887_v3, 1 }
  0xeb   : > { %v3221_v10 = vld [vmem:[#allocation2 + $0x20] sm:$0xff]  ;;  %v2024_v17 = vshrl.u32 %v3215_v5, 16  ;;  %v2027_v23 = vshll.u32 %v3215_v5, 16  ;;  %v2227_v24 = vrot.slane %v3215_v5, 3 }
  0xec   : > { %v489_v8 = vmax.f32 %v447_v63, 0.0  ;;  %v828_v11 = vrot.slane %v826_v7, 1  ;;  %v3225_v20 = vsel %vm1071_vm7, %v1077_v27, %v1079_v12  ;;  %v1653_v25 = vrot.slane %v3221_v10, 2 }
  0xed   : > { %v2026_v22 = vrot.slane %v2024_v17, 2  ;;  %v2029_v29 = vrot.slane %v2027_v23, 3  ;;  %v3235_v27 = vsel %vm404_vm1, %v2225_v47, %v2227_v24  ;;  %v2913_v47 = vld [vmem:[%s3871_s4 + $0x68] sm:$0xff]  ;;  %v1859_v63 = vrot.slane %v3168_v16, 2 }
  0xee   : > { %v650_v19 = vmul.f32 %v582_v13, %v489_v8  ;;  %v829_v21 = vsel %vm793_vm5, %v824_v14, %v828_v11  ;;  %v3238_v31 = vsel %vm1647_vm8, %v1651_v48, %v1653_v25  ;;  %v830_v48 = vshrl.u32 %v2887_v3, 16  ;;  %1570 = vmatpush.bf16.msrb.mxu2 %v2913_v47  ;;  %v602_v47 = vpop.permute.xlu0 %601 }
  0xef   : > { %2590 = vmatmul.msk.bf16.gmra.mxu1 %vm888_vm6, %v829_v21  ;;  %v2030_v32 = vor.u32 %v2029_v29, %v2026_v22  ;;  %v1858_v17 = vrot.slane %v3161_v9, 2 }
  0xf0   : > { %v673_v15 = vpack.c.bf16 %v650_v19, %v650_v19  ;;  %v832_v60 = vor.u32 %v830_v48, %v828_v11 }
  0xf1   : > { %v449_v28 = vpop.f32.mrf.mxu0  ;;  %v3243_v36 = vsel %vm2005_vm9, %v2021_v59, %v2030_v32  ;;  %v592_v59 = vpop.permute.xlu1 %591  ;;  %v1860_v22 = vsel %vm1647_vm8, %v1858_v17, %v1859_v63 }
  0xf2   : > { %697 = vst.msk [vmem:[#allocation2 + $0x2c] sm:$0xf] %vm685_vm4, %v673_v15  ;;  %v450_v30 = vadd.f32 %v3081_v39, %v449_v28  ;;  %v597_v28 = vpop.permute.xlu2 %596 }
  0xf4   : > { %v490_v33 = vmax.f32 %v450_v30, 0.0  ;;  %2610 = vmatmul.msk.bf16.gmra.mxu0 %vm888_vm6, %v3134_v44 }
  0xf6   : > { %v651_v38 = vmul.f32 %v587_v35, %v490_v33 }
  0xf8   : > { %v674_v41 = vpack.c.bf16 %v651_v38, %v651_v38  ;;  %v2900_v38 = vld [vmem:[%s3871_s4 + $0x40] sm:$0xff] }
  0xf9   : > { %v451_v43 = vpop.f32.mrf.mxu0  ;;  %v3248_v45 = vld [vmem:[#allocation2 + $0x28] sm:$0xff]  ;;  %1141 = vmatpush.bf16.msrb.mxu3 %v2900_v38 }
  0xfa   : > { %v3250_v46 = vld [vmem:[#allocation2 + $0x28] sm:$0xff]  ;;  %698 = vst.msk [vmem:[#allocation2 + $0x30] sm:$0xf] %vm685_vm4, %v674_v41  ;;  %v452_v44 = vadd.f32 %v3081_v39, %v451_v43  ;;  %2613 = vmatmul.msk.bf16.gmra.mxu2 %vm888_vm6, %v3248_v45  ;;  %v834_v49 = vshll.u32 %v3248_v45, 16  ;;  %v1081_v57 = vrot.slane %v3248_v45, 1 }
  0xfb   : > { %v3263_v54 = vld [vmem:[#allocation2 + $0x28] sm:$0xff]  ;;  %v2033_v0 = vshrl.u32 %v3250_v46, 16  ;;  %v2036_v7 = vshll.u32 %v3250_v46, 16  ;;  %v2229_v13 = vrot.slane %v3250_v46, 3 }
  0xfc   : > { %v491_v53 = vmax.f32 %v452_v44, 0.0  ;;  %v836_v61 = vrot.slane %v834_v49, 1  ;;  %v3268_v2 = vsel %vm1071_vm7, %v1079_v12, %v1081_v57  ;;  %v1655_v14 = vrot.slane %v3263_v54, 2 }
  0xfd   : > { %v2035_v6 = vrot.slane %v2033_v0, 2  ;;  %v2038_v19 = vrot.slane %v2036_v7, 3  ;;  %v3280_v16 = vsel %vm404_vm1, %v2227_v24, %v2229_v13 }
  0xfe   : > { %v652_v1 = vmul.f32 %v592_v59, %v491_v53  ;;  %v837_v3 = vsel %vm793_vm5, %v832_v60, %v836_v61  ;;  %v3283_v21 = vsel %vm1647_vm8, %v1653_v25, %v1655_v14 }
  0xff   : > { %2591 = vmatmul.msk.bf16.gmra.mxu1 %vm888_vm6, %v837_v3  ;;  %v2039_v23 = vor.u32 %v2038_v19, %v2035_v6 }
 0x100   : > { %v675_v8 = vpack.c.bf16 %v652_v1, %v652_v1 }
 0x101   : > { %v454_v11 = vpop.f32.mrf.mxu0  ;;  %v3288_v9 = vsel %vm2005_vm9, %v2030_v32, %v2039_v23  ;;  %v838_v32 = vshrl.u32 %v3248_v45, 16  ;;  %v1861_v45 = vrot.slane %v3215_v5, 2 }
 0x102   : > { %699 = vst.msk [vmem:[#allocation2 + $0x34] sm:$0xf] %vm685_vm4, %v675_v8  ;;  %v455_v12 = vadd.f32 %v3081_v39, %v454_v11 }
 0x103   : > { %v840_v48 = vor.u32 %v838_v32, %v836_v61  ;;  %v1862_v19 = vsel %vm1647_vm8, %v1859_v63, %v1861_v45 }
 0x104   : > { %v492_v15 = vmax.f32 %v455_v12, 0.0  ;;  %2807 = vmatmul.msk.bf16.vlgmr.msra.gmra.mxu0 %vm888_vm6, %v1860_v22  ;;  %v1208_v12 = vld [vmem:[#allocation2 + $0x8] sm:$0xe] }
 0x106   : > { %v653_v29 = vmul.f32 %v597_v28, %v492_v15  ;;  %v607_v28 = vpop.permute.xlu1 %606 }
 0x108   : > { %v676_v30 = vpack.c.bf16 %v653_v29, %v653_v29 }
 0x109   : > { %v456_v33 = vpop.f32.mrf.mxu0  ;;  %v3290_v35 = vld [vmem:[#allocation2 + $0x30] sm:$0xff] }
 0x10a   : > { %v3292_v24 = vld [vmem:[#allocation2 + $0x30] sm:$0xff]  ;;  %700 = vst.msk [vmem:[#allocation2 + $0x38] sm:$0xf] %vm685_vm4, %v676_v30  ;;  %v457_v25 = vadd.f32 %v3081_v39, %v456_v33  ;;  %2614 = vmatmul.msk.bf16.gmra.mxu2 %vm888_vm6, %v3290_v35  ;;  %v842_v40 = vshll.u32 %v3290_v35, 16  ;;  %v1083_v44 = vrot.slane %v3290_v35, 1  ;;  %v1253_v33 = vunpack.c.l.b16 %v1208_v12 }
 0x10b   : > { %v3303_v43 = vld [vmem:[#allocation2 + $0x30] sm:$0xff]  ;;  %v2042_v50 = vshrl.u32 %v3292_v24, 16  ;;  %v2045_v1 = vshll.u32 %v3292_v24, 16  ;;  %v2231_v6 = vrot.slane %v3292_v24, 3  ;;  %v846_v37 = vshrl.u32 %v3290_v35, 16 }
 0x10c   : > { %v493_v41 = vmax.f32 %v457_v25, 0.0  ;;  %v844_v49 = vrot.slane %v842_v40, 1  ;;  %v3308_v59 = vsel %vm1071_vm7, %v1081_v57, %v1083_v44  ;;  %v1657_v61 = vrot.slane %v3303_v43, 2 }
 0x10d   : > { %v2044_v0 = vrot.slane %v2042_v50, 2  ;;  %v2047_v8 = vrot.slane %v2045_v1, 3  ;;  %v3319_v11 = vsel %vm404_vm1, %v2229_v13, %v2231_v6  ;;  %v2912_v13 = vld [vmem:[%s3871_s4 + $0x60] sm:$0xff]  ;;  %v3336_v25 = vpack.c.b16 %v1254_v42, %v1253_v33 }
 0x10e   : > { %v654_v53 = vmul.f32 %v602_v47, %v493_v41  ;;  %v845_v60 = vsel %vm793_vm5, %v840_v48, %v844_v49  ;;  %v3322_v17 = vsel %vm1647_vm8, %v1655_v14, %v1657_v61  ;;  %1571 = vmatpush.bf16.msrb.mxu2 %v2912_v13  ;;  %v1283_v40 = vrot.slane %v3140_v51, 1  ;;  %v2899_v41 = vld [vmem:[%s3871_s4 + $0x38] sm:$0xff] }
 0x10f   : > { %2592 = vmatmul.msk.bf16.gmra.mxu1 %vm888_vm6, %v845_v60  ;;  %v2048_v22 = vor.u32 %v2047_v8, %v2044_v0  ;;  %v1282_v48 = vrot.slane %v3336_v25, 1  ;;  %1142 = vmatpush.bf16.msrb.mxu3 %v2899_v41  ;;  %v612_v60 = vpop.permute.xlu2 %611  ;;  %v848_v0 = vor.u32 %v846_v37, %v844_v49 }
 0x110   : > { %v677_v3 = vpack.c.bf16 %v654_v53, %v654_v53 }
 0x111   : > { %v459_v7 = vpop.f32.mrf.mxu0  ;;  %v3329_v29 = vsel %vm2005_vm9, %v2039_v23, %v2048_v22  ;;  %v1284_v35 = vsel %vm1071_vm7, %v1282_v48, %v1283_v40 }
 0x112   : > { %701 = vst.msk [vmem:[#allocation2 + $0x3c] sm:$0xf] %vm685_vm4, %v677_v3  ;;  %v460_v57 = vadd.f32 %v3081_v39, %v459_v7 }
 0x114   : > { %v494_v15 = vmax.f32 %v460_v57, 0.0  ;;  %2808 = vmatmul.msk.bf16.gmra.mxu0 %vm888_vm6, %v1862_v19  ;;  %v1863_v19 = vrot.slane %v3250_v46, 2  ;;  %v2934_v46 = vld [vmem:[%s3871_s4 + $0xd0] sm:$0xff] }
 0x115   : > { %2293 = vmatpush.bf16.msra.mxu2 %v2934_v46 }
 0x116   : > { %v655_v30 = vmul.f32 %v607_v28, %v494_v15 }
 0x118   : > { %v678_v14 = vpack.c.bf16 %v655_v30, %v655_v30 }
 0x119   : > { %v461_v63 = vpop.f32.mrf.mxu0  ;;  %v3338_v38 = vld [vmem:[#allocation2 + $0x38] sm:$0xff] }
 0x11a   : > { %v3340_v32 = vld [vmem:[#allocation2 + $0x38] sm:$0xff]  ;;  %702 = vst.msk [vmem:[#allocation2 + $0x40] sm:$0xf] %vm685_vm4, %v678_v14  ;;  %v462_v23 = vadd.f32 %v3081_v39, %v461_v63  ;;  %2615 = vmatmul.msk.bf16.gmra.mxu2 %vm888_vm6, %v3338_v38  ;;  %v850_v42 = vshll.u32 %v3338_v38, 16  ;;  %v1085_v53 = vrot.slane %v3338_v38, 1 }
 0x11b   : > { %v3353_v50 = vld [vmem:[#allocation2 + $0x38] sm:$0xff]  ;;  %v2051_v3 = vshrl.u32 %v3340_v32, 16  ;;  %v2054_v15 = vshll.u32 %v3340_v32, 16  ;;  %v2233_v49 = vrot.slane %v3340_v32, 3 }
 0x11c   : > { %v495_v47 = vmax.f32 %v462_v23, 0.0  ;;  %v852_v1 = vrot.slane %v850_v42, 1  ;;  %v3361_v8 = vsel %vm1071_vm7, %v1083_v44, %v1085_v53  ;;  %v1659_v30 = vrot.slane %v3353_v50, 2  ;;  %v617_v42 = vpop.permute.xlu0 %616 }
 0x11d   : > { %v2053_v12 = vrot.slane %v2051_v3, 2  ;;  %v2056_v13 = vrot.slane %v2054_v15, 3  ;;  %v3373_v14 = vsel %vm404_vm1, %v2231_v6, %v2233_v49  ;;  %v1864_v23 = vsel %vm1647_vm8, %v1861_v45, %v1863_v19  ;;  %v2898_v3 = vld [vmem:[%s3871_s4 + $0x30] sm:$0xff] }
 0x11e   : > { %v656_v7 = vmul.f32 %v612_v60, %v495_v47  ;;  %v853_v57 = vsel %vm793_vm5, %v848_v0, %v852_v1  ;;  %v3378_v63 = vsel %vm1647_vm8, %v1657_v61, %v1659_v30  ;;  %v1285_v45 = vrot.slane %v3184_v26, 1  ;;  %1143 = vmatpush.bf16.msrb.mxu3 %v2898_v3 }
 0x11f   : > { %2593 = vmatmul.msk.bf16.vlgmr.msra.gmra.mxu3 %vm888_vm6, %v853_v57  ;;  %2694 = vmatmul.msk.bf16.vlgmr.msrb.gmra.mxu1 %vm888_vm6, %v1284_v35  ;;  %v3385_v41 = vor.u32 %v2056_v13, %v2053_v12  ;;  %v1431_v57 = vshrl.u32 %v3336_v25, 16 }
 0x120   : > { %v679_v28 = vpack.c.bf16 %v656_v7, %v656_v7 }
 0x121   : > { %v464_v33 = vpop.f32.mrf.mxu0  ;;  %v3390_v6 = vsel %vm2005_vm9, %v2048_v22, %v3385_v41  ;;  %v854_v22 = vshrl.u32 %v3338_v38, 16  ;;  %v1286_v38 = vsel %vm1071_vm7, %v1283_v40, %v1285_v45  ;;  %v1434_v40 = vshll.u32 %v3336_v25, 16 }
 0x122   : > { %703 = vst.msk [vmem:[#allocation2 + $0x44] sm:$0xf] %vm685_vm4, %v679_v28  ;;  %v465_v44 = vadd.f32 %v3081_v39, %v464_v33  ;;  %v622_v28 = vpop.permute.xlu1 %621 }
 0x123   : > { %v856_v33 = vor.u32 %v854_v22, %v852_v1 }
 0x124   : > { %v496_v37 = vmax.f32 %v465_v44, 0.0  ;;  %2809 = vmatmul.msk.bf16.gmra.mxu0 %vm888_vm6, %v1864_v23  ;;  %v1439_v44 = vshrl.u32 %v3140_v51, 16 }
 0x126   : > { %v657_v47 = vmul.f32 %v617_v42, %v496_v37  ;;  %v1442_v42 = vshll.u32 %v3140_v51, 16 }
 0x128   : > { %v680_v48 = vpack.c.bf16 %v657_v47, %v657_v47 }
 0x129   : > { %v466_v61 = vpop.f32.mrf.mxu0  ;;  %v3392_v60 = vld [vmem:[#allocation2 + $0x40] sm:$0xff] }
 0x12a   : > { %v3394_v0 = vld [vmem:[#allocation2 + $0x40] sm:$0xff]  ;;  %704 = vst.msk [vmem:[#allocation2 + $0x48] sm:$0xf] %vm685_vm4, %v680_v48  ;;  %v467_v5 = vadd.f32 %v3081_v39, %v466_v61  ;;  %2616 = vmatmul.msk.bf16.gmra.mxu2 %vm888_vm6, %v3392_v60  ;;  %v858_v7 = vshll.u32 %v3392_v60, 16  ;;  %v1087_v15 = vrot.slane %v3392_v60, 1  ;;  %v3875_v48 = vrot.slane %v3292_v24, 2 }
 0x12b   : > { %v3407_v12 = vld [vmem:[#allocation2 + $0x40] sm:$0xff]  ;;  %v2060_v23 = vshrl.u32 %v3394_v0, 16  ;;  %v2235_v51 = vrot.slane %v3394_v0, 3 }
 0x12c   : > { %v497_v35 = vmax.f32 %v467_v5, 0.0  ;;  %v3410_v13 = vrot.slane %v858_v7, 1  ;;  %v3421_v47 = vsel %vm1071_vm7, %v1085_v53, %v1087_v15  ;;  %v2063_v5 = vshll.u32 %v3394_v0, 16 }
 0x12d   : > { %v2062_v61 = vrot.slane %v2060_v23, 2  ;;  %v3876_v53 = vrot.slane %v3407_v12, 2  ;;  %v1441_v7 = vrot.slane %v1439_v44, 1  ;;  %v1444_v23 = vrot.slane %v1442_v42, 2 }
 0x12e   : > { %v658_v37 = vmul.f32 %v622_v28, %v497_v35  ;;  %v861_v1 = vsel %vm793_vm5, %v856_v33, %v3410_v13  ;;  %v2065_v28 = vrot.slane %v2063_v5, 3  ;;  %v3438_v25 = vsel %vm404_vm1, %v2233_v49, %v2235_v51 }
 0x12f   : > { %2594 = vmatmul.msk.bf16.gmra.mxu3 %vm888_vm6, %v861_v1  ;;  %2695 = vmatmul.msk.bf16.gmra.mxu1 %vm888_vm6, %v1286_v38  ;;  %v2917_v38 = vld [vmem:[%s3871_s4 + $0x88] sm:$0xff]  ;;  %v1866_v44 = vsel %vm1647_vm8, %v1863_v19, %v3875_v48  ;;  %v3450_v42 = vsel %vm1647_vm8, %v1659_v30, %v3876_v53  ;;  %v1436_v49 = vrot.slane %v1434_v40, 2 }
 0x130   : > { %v681_v3 = vpack.c.bf16 %v658_v37, %v658_v37  ;;  %v2066_v1 = vor.u32 %v2065_v28, %v2062_v61  ;;  %1717 = vmatpush.bf16.msra.mxu3 %v2917_v38  ;;  %v3460_v28 = vor.u32 %v1444_v23, %v1441_v7  ;;  %v2931_v23 = vld [vmem:[%s3871_s4 + $0xb8] sm:$0xff] }
 0x131   : > { %v469_v22 = vpop.f32.mrf.mxu0  ;;  %v737_v35 = vld [vmem:[#allocation2 + $0x48] sm:$0x1]  ;;  %2145 = vmatpush.bf16.msra.mxu1 %v2931_v23 }
 0x132   : > { %705 = vst.msk [vmem:[#allocation2 + $0x4c] sm:$0xf] %vm685_vm4, %v681_v3  ;;  %v470_v33 = vadd.f32 %v3081_v39, %v469_v22  ;;  %v782_v37 = vunpack.c.l.b16 %v737_v35  ;;  %v1433_v3 = vrot.slane %v1431_v57, 1  ;;  %v627_v35 = vpop.permute.xlu2 %626  ;;  %v3458_v19 = vsel %vm2005_vm9, %v3385_v41, %v2066_v1 }
 0x134   : > { %v498_v5 = vmax.f32 %v470_v33, 0.0  ;;  %2810 = vmatmul.msk.bf16.gmra.mxu0 %vm888_vm6, %v1866_v44  ;;  %v792_v22 = vpack.c.b16 %v782_v37, %v782_v37  ;;  %v1437_v40 = vor.u32 %v1436_v49, %v1433_v3  ;;  %v3877_v3 = vrot.slane %v3221_v10, 1 }
 0x136   : > { %v659_v61 = vmul.f32 %v627_v35, %v498_v5  ;;  %v1089_v30 = vrot.slane %v792_v22, 1  ;;  %v866_v33 = vshll.u32 %v792_v22, 16  ;;  %v1446_v7 = vsel %vm1429_vm11, %v1437_v40, %v3460_v28 }
 0x137   : > { %v862_v5 = vshrl.u32 %v3392_v60, 16  ;;  %v1448_v60 = vshrl.u32 %v3184_v26, 16  ;;  %v1288_v48 = vsel %vm1071_vm7, %v1285_v45, %v3877_v3 }
 0x138   : > { %v682_v57 = vpack.c.bf16 %v659_v61, %v659_v61  ;;  %v3463_v37 = vsel %vm1071_vm7, %v1087_v15, %v1089_v30  ;;  %v868_v15 = vrot.slane %v866_v33, 1  ;;  %v632_v30 = vpop.permute.xlu0 %631  ;;  %v1451_v33 = vshll.u32 %v3184_v26, 16 }
 0x139   : > { %v471_v38 = vpop.f32.mrf.mxu0  ;;  %v3465_v44 = vld [vmem:[#allocation2 + $0x48] sm:$0xff]  ;;  %v864_v40 = vor.u32 %v862_v5, %v3410_v13  ;;  %v1867_v13 = vrot.slane %v3340_v32, 2 }
 0x13a   : > { %706 = vst.msk [vmem:[#allocation2 + $0x50] sm:$0xf] %vm685_vm4, %v682_v57  ;;  %v472_v41 = vadd.f32 %v3081_v39, %v471_v38  ;;  %2721 = vmatmul.msk.bf16.vlgmr.msrb.gmra.mxu2 %vm888_vm6, %v1446_v7  ;;  %v3477_v49 = vld [vmem:[#allocation2 + $0x48] sm:$0xff]  ;;  %v2069_v35 = vshrl.u32 %v3465_v44, 16  ;;  %v2072_v46 = vshll.u32 %v3465_v44, 16  ;;  %v2237_v61 = vrot.slane %v3465_v44, 3 }
 0x13b   : > { %v869_v23 = vsel %vm793_vm5, %v864_v40, %v868_v15  ;;  %v1663_v5 = vrot.slane %v3477_v49, 2  ;;  %v3879_v15 = vrot.slane %v3407_v12, 2  ;;  %v1453_v32 = vrot.slane %v1451_v33, 2 }
 0x13c   : > { %v499_v22 = vmax.f32 %v472_v41, 0.0  ;;  %v3482_v57 = vpop.f32.mrf.mxu1  ;;  %v2071_v7 = vrot.slane %v2069_v35, 2  ;;  %v2074_v52 = vrot.slane %v2072_v46, 3  ;;  %v3488_v41 = vsel %vm404_vm1, %v2235_v51, %v2237_v61 }
 0x13d   : > { %v1450_v35 = vrot.slane %v1448_v60, 1 }
 0x13e   : > { %v660_v38 = vmul.f32 %v632_v30, %v499_v22  ;;  %v2075_v22 = vor.u32 %v2074_v52, %v2071_v7  ;;  %v3503_v30 = vsel %vm1647_vm8, %v3879_v15, %v1663_v5  ;;  %v637_v7 = vpop.permute.xlu1 %636 }
 0x13f   : > { %2595 = vmatmul.msk.bf16.gmra.mxu3 %vm888_vm6, %v869_v23  ;;  %2696 = vmatmul.msk.bf16.gmra.mxu1 %vm888_vm6, %v1288_v48  ;;  %v3880_v48 = vrot.slane %v3292_v24, 2  ;;  %v1454_v15 = vor.u32 %v1453_v32, %v1450_v35  ;;  %v1289_v35 = vrot.slane %v3263_v54, 1 }
 0x140   : > { %v683_v53 = vpack.c.bf16 %v660_v38, %v660_v38  ;;  %v3508_v40 = vsel %vm2005_vm9, %v2066_v1, %v2075_v22  ;;  %v2940_v1 = vld [vmem:[#allocation2] sm:$0xe] }
 0x141   : > { %v474_v51 = vpop.f32.mrf.mxu0  ;;  %v1418_v46 = vld [vmem:[#allocation2 + $0x50] sm:$0x3]  ;;  %v1868_v52 = vsel %vm1647_vm8, %v3880_v48, %v1867_v13 }
 0x142   : > { %707 = vst.msk [vmem:[#allocation2 + $0x54] sm:$0xf] %vm685_vm4, %v683_v53  ;;  %v475_v26 = vadd.f32 %v3081_v39, %v474_v51  ;;  %v1427_v45 = vunpack.c.l.b16 %v1418_v46  ;;  %v2939_v39 = vld [vmem:[#allocation2] sm:$0xf0] }
 0x143   : > { %v2941_v3 = vor.u32 %v2940_v1, %v2939_v39 }
 0x144   : > { %v500_v60 = vmax.f32 %v475_v26, 0.0  ;;  %2811 = vmatmul.msk.bf16.gmra.mxu0 %vm888_vm6, %v1868_v52  ;;  %v3514_v38 = vpack.c.b16 %v1427_v45, %v1427_v45  ;;  %v3516_v23 = vpop.f32.mrf.mxu1  ;;  %v1455_v45 = vsel %vm1429_vm11, %v3460_v28, %v1454_v15  ;;  %v1457_v28 = vshrl.u32 %v3221_v10, 16 }
 0x146   : > { %v661_v53 = vmul.f32 %v637_v7, %v500_v60  ;;  %v1665_v33 = vrot.slane %v3514_v38, 2  ;;  %v1072_v7 = vrot.slane %v2941_v3, 1  ;;  %v1869_v3 = vrot.slane %v3394_v0, 2 }
 0x148   : > { %v684_v51 = vpack.c.bf16 %v661_v53, %v661_v53  ;;  %v3522_v26 = vsel %vm1647_vm8, %v1663_v5, %v1665_v33  ;;  %v1460_v33 = vshll.u32 %v3221_v10, 16 }
 0x149   : > { %v476_v46 = vpop.f32.mrf.mxu0  ;;  %v3519_v24 = vld [vmem:[#allocation2 + $0x50] sm:$0xff]  ;;  %3881 = vst [vmem:[#allocation3_spill] sm:$0xff] %v3522_v26  ;;  %v1487_v26 = vshll.u32 %v3353_v50, 16 }
 0x14a   : > { %709 = vst.msk [vmem:[#allocation2 + $0x58] sm:$0x3] %vm708_vm10, %v684_v51  ;;  %2722 = vmatmul.msk.bf16.gmra.mxu2 %vm888_vm6, %v1455_v45  ;;  %v2078_v32 = vshrl.u32 %v3519_v24, 16  ;;  %v2081_v48 = vshll.u32 %v3519_v24, 16  ;;  %v3878_v52 = vrot.slane %v3519_v24, 3  ;;  %v3882_v51 = vrot.slane %v3119_v18, 1 }
 0x14b   : > { %v3883_v46 = vrot.slane %v3221_v10, 1  ;;  %v1462_v18 = vrot.slane %v1460_v33, 2  ;;  %v1871_v33 = vrot.slane %v3465_v44, 2 }
 0x14c   : > { %v3532_v60 = vpop.f32.mrf.mxu1  ;;  %v2080_v5 = vrot.slane %v2078_v32, 2  ;;  %v2083_v53 = vrot.slane %v2081_v48, 3  ;;  %v3537_v39 = vsel %vm404_vm1, %v2237_v61, %v3878_v52  ;;  %v1074_v1 = vsel %vm1071_vm7, %v1072_v7, %v3882_v51 }
 0x14d   : > { %v1290_v45 = vsel %vm1071_vm7, %v3883_v46, %v1289_v35  ;;  %v1459_v48 = vrot.slane %v1457_v28, 1  ;;  %v1870_v7 = vsel %vm1647_vm8, %v1867_v13, %v1869_v3  ;;  %v1469_v28 = vshll.u32 %v3263_v54, 16 }
 0x14e   : > { %v3548_v32 = vor.u32 %v2083_v53, %v2080_v5  ;;  %v1291_v5 = vrot.slane %v3303_v43, 1 }
 0x14f   : > { %2635 = vmatmul.msk.bf16.vlgmr.msrb.gmra.mxu3 %vm888_vm6, %v1074_v1  ;;  %2697 = vmatmul.msk.bf16.gmra.mxu1 %vm888_vm6, %v1290_v45  ;;  %v1463_v51 = vor.u32 %v1462_v18, %v1459_v48  ;;  %v1471_v45 = vrot.slane %v1469_v28, 2  ;;  %v1872_v48 = vsel %vm1647_vm8, %v1869_v3, %v1871_v33  ;;  %v2930_v18 = vld [vmem:[%s3871_s4 + $0xb0] sm:$0xff]  ;;  %v1293_v3 = vrot.slane %v3353_v50, 1 }
 0x150   : > { %v3554_v61 = vsel %vm2005_vm9, %v2075_v22, %v3548_v32  ;;  %v1466_v22 = vshrl.u32 %v3263_v54, 16  ;;  %v1292_v13 = vsel %vm1071_vm7, %v1289_v35, %v1291_v5  ;;  %2146 = vmatpush.bf16.msra.mxu1 %v2930_v18 }
 0x151   : > { %v1464_v0 = vsel %vm1429_vm11, %v1454_v15, %v1463_v51  ;;  %v2916_v15 = vld [vmem:[%s3871_s4 + $0x80] sm:$0xff] }
 0x152   : > { %v1468_v46 = vrot.slane %v1466_v22, 1  ;;  %1718 = vmatpush.bf16.msra.mxu3 %v2916_v15  ;;  %v1478_v15 = vshll.u32 %v3303_v43, 16 }
 0x154   : > { %2812 = vmatmul.msk.bf16.gmra.mxu0 %vm888_vm6, %v1870_v7  ;;  %v3558_v10 = vpop.f32.mrf.mxu1  ;;  %v1472_v44 = vor.u32 %v1471_v45, %v1468_v46  ;;  %v1294_v46 = vsel %vm1071_vm7, %v1291_v5, %v1293_v3  ;;  %v1873_v45 = vrot.slane %v3519_v24, 2 }
 0x156   : > { %v1473_v7 = vsel %vm1429_vm11, %v1463_v51, %v1472_v44 }
 0x15a   : > { %2723 = vmatmul.msk.bf16.gmra.mxu2 %vm888_vm6, %v1464_v0 }
 0x15c   : > { %v3563_v53 = vpop.f32.mrf.mxu1 }
 0x15d   : > { %v1030_v1 = vpop.f32.mrf.mxu2 }
 0x15f   : > { %2636 = vmatmul.msk.bf16.gmra.mxu3 %vm888_vm6, %v3149_v58  ;;  %2698 = vmatmul.msk.bf16.gmra.mxu1 %vm888_vm6, %v1292_v13  ;;  %v2933_v58 = vld [vmem:[%s3871_s4 + $0xc8] sm:$0xff]  ;;  %v1475_v13 = vshrl.u32 %v3303_v43, 16 }
 0x160   : > { %2294 = vmatpush.bf16.msra.mxu2 %v2933_v58  ;;  %v1874_v58 = vsel %vm1647_vm8, %v1871_v33, %v1873_v45 }
 0x161   : > { %v1477_v51 = vrot.slane %v1475_v13, 1 }
 0x164   : > { %2813 = vmatmul.msk.bf16.gmra.mxu0 %vm888_vm6, %v1872_v48  ;;  %v3577_v54 = vpop.f32.mrf.mxu1  ;;  %v1480_v48 = vrot.slane %v1478_v15, 2 }
 0x165   : > { %v1032_v35 = vpop.f32.mrf.mxu2 }
 0x16a   : > { %2724 = vmatmul.msk.bf16.gmra.mxu2 %vm888_vm6, %v1473_v7 }
 0x16c   : > { %v940_v0 = vpop.f32.mrf.mxu1 }
 0x16d   : > { %v3588_v22 = vadd.f32 %v1030_v1, %v940_v0  ;;  %v1035_v28 = vpop.f32.mrf.mxu2  ;;  %v1802_v1 = vld [vmem:[#allocation2 + $0x58] sm:$0x3]  ;;  %v1481_v0 = vor.u32 %v1480_v48, %v1477_v51 }
 0x16e   : > { %v1847_v5 = vunpack.c.l.b16 %v1802_v1 }
 0x16f   : > { %2637 = vmatmul.msk.bf16.gmra.mxu3 %vm888_vm6, %v3189_v34  ;;  %2699 = vmatmul.msk.bf16.gmra.mxu1 %vm888_vm6, %v1294_v46  ;;  %v1482_v52 = vsel %vm1429_vm11, %v1472_v44, %v1481_v0  ;;  %v1295_v34 = vrot.slane %v3407_v12, 1  ;;  %v1489_v44 = vrot.slane %v1487_v26, 2 }
 0x170   : > { %v1857_v46 = vpack.c.b16 %v1847_v5, %v1847_v5 }
 0x174   : > { %2814 = vmatmul.msk.bf16.gmra.mxu0 %vm888_vm6, %v1874_v58  ;;  %v942_v18 = vpop.f32.mrf.mxu1  ;;  %v1484_v58 = vshrl.u32 %v3353_v50, 16 }
 0x175   : > { %v3599_v7 = vadd.f32 %v1032_v35, %v942_v18  ;;  %v1037_v43 = vpop.f32.mrf.mxu2  ;;  %v1296_v35 = vsel %vm1071_vm7, %v1293_v3, %v1295_v34  ;;  %v1875_v18 = vrot.slane %v1857_v46, 2  ;;  %v1297_v3 = vrot.slane %v3477_v49, 1 }
 0x177   : > { %v1876_v51 = vsel %vm1647_vm8, %v1873_v45, %v1875_v18 }
 0x17a   : > { %2725 = vmatmul.msk.bf16.gmra.mxu2 %vm888_vm6, %v1482_v52  ;;  %v1486_v52 = vrot.slane %v1484_v58, 1  ;;  %v1298_v58 = vsel %vm1071_vm7, %v1295_v34, %v1297_v3 }
 0x17c   : > { %v945_v13 = vpop.f32.mrf.mxu1  ;;  %v1490_v5 = vor.u32 %v1489_v44, %v1486_v52 }
 0x17d   : > { %v3604_v15 = vadd.f32 %v1035_v28, %v945_v13  ;;  %v1040_v33 = vpop.f32.mrf.mxu2  ;;  %v1493_v13 = vshrl.u32 %v3407_v12, 16 }
 0x17e   : > { %v1491_v50 = vsel %vm1429_vm11, %v1481_v0, %v1490_v5  ;;  %v1226_v0 = vld [vmem:[#allocation2 + $0x50] sm:$0x1] }
 0x17f   : > { %2638 = vmatmul.msk.bf16.gmra.mxu3 %vm888_vm6, %v3225_v20  ;;  %2700 = vmatmul.msk.bf16.gmra.mxu1 %vm888_vm6, %v1296_v35  ;;  %v2929_v20 = vld [vmem:[%s3871_s4 + $0xa8] sm:$0xff]  ;;  %v2915_v35 = vld [vmem:[%s3871_s4 + $0x78] sm:$0xff]  ;;  %v1271_v52 = vunpack.c.l.b16 %v1226_v0 }
 0x180   : > { %2147 = vmatpush.bf16.msra.mxu1 %v2929_v20  ;;  %1719 = vmatpush.bf16.msra.mxu3 %v2915_v35 }
 0x181   : > { %v1281_v34 = vpack.c.b16 %v1271_v52, %v1271_v52 }
 0x183   : > { %v1299_v20 = vrot.slane %v1281_v34, 1 }
 0x184   : > { %2815 = vmatmul.msk.bf16.gmra.mxu0 %vm888_vm6, %v1876_v51  ;;  %v947_v28 = vpop.f32.mrf.mxu1 }
 0x185   : > { %v3614_v48 = vadd.f32 %v1037_v43, %v947_v28  ;;  %v1042_v1 = vpop.f32.mrf.mxu2  ;;  %v1496_v43 = vshll.u32 %v3407_v12, 16 }
 0x187   : > { %v1498_v18 = vrot.slane %v1496_v43, 2  ;;  %v1502_v43 = vshrl.u32 %v3477_v49, 16 }
 0x189   : > { %v1504_v0 = vrot.slane %v1502_v43, 1 }
 0x18a   : > { %2726 = vmatmul.msk.bf16.gmra.mxu2 %vm888_vm6, %v1491_v50 }
 0x18c   : > { %v950_v26 = vpop.f32.mrf.mxu1 }
 0x18d   : > { %v3622_v46 = vadd.f32 %v1040_v33, %v950_v26  ;;  %v1045_v45 = vpop.f32.mrf.mxu2  ;;  %v1495_v33 = vrot.slane %v1493_v13, 1 }
 0x18f   : > { %2639 = vmatmul.msk.bf16.gmra.mxu3 %vm888_vm6, %v3268_v2  ;;  %2701 = vmatmul.msk.bf16.gmra.mxu1 %vm888_vm6, %v1298_v58  ;;  %v1499_v28 = vor.u32 %v1498_v18, %v1495_v33  ;;  %v2932_v2 = vld [vmem:[%s3871_s4 + $0xc0] sm:$0xff]  ;;  %v1300_v58 = vsel %vm1071_vm7, %v1297_v3, %v1299_v20  ;;  %v1514_v20 = vshll.u32 %v3514_v38, 16 }
 0x190   : > { %2295 = vmatpush.bf16.msra.mxu2 %v2932_v2 }
 0x191   : > { %v1500_v50 = vsel %vm1429_vm11, %v1490_v5, %v1499_v28  ;;  %v1516_v43 = vrot.slane %v1514_v20, 2 }
 0x194   : > { %v952_v44 = vpop.f32.mrf.mxu1 }
 0x195   : > { %v3633_v51 = vadd.f32 %v1042_v1, %v952_v44  ;;  %v1047_v12 = vpop.f32.mrf.mxu2  ;;  %v1505_v1 = vshll.u32 %v3477_v49, 16 }
 0x197   : > { %v1507_v35 = vrot.slane %v1505_v1, 2 }
 0x199   : > { %v1508_v44 = vor.u32 %v1507_v35, %v1504_v0 }
 0x19a   : > { %2727 = vmatmul.msk.bf16.gmra.mxu2 %vm888_vm6, %v1500_v50 }
 0x19b   : > { %v1509_v2 = vsel %vm1429_vm11, %v1499_v28, %v1508_v44 }
 0x19c   : > { %v1355_v26 = vpop.f32.mrf.mxu1 }
 0x19d   : > { %v1050_v13 = vpop.f32.mrf.mxu2 }
 0x19f   : > { %2640 = vmatmul.msk.bf16.gmra.mxu3 %vm888_vm6, %v3308_v59  ;;  %2702 = vmatmul.msk.bf16.gmra.mxu1 %vm888_vm6, %v1300_v58  ;;  %v1511_v59 = vshrl.u32 %v3514_v38, 16 }
 0x1a2   : > { %v955_v33 = vpop.f32.mrf.mxu3 }
 0x1a3   : > { %v3646_v5 = vadd.f32 %v1045_v45, %v955_v33  ;;  %v1513_v45 = vrot.slane %v1511_v59, 1 }
 0x1a4   : > { %v1357_v18 = vpop.f32.mrf.mxu1 }
 0x1a5   : > { %v1052_v52 = vpop.f32.mrf.mxu2  ;;  %v1517_v0 = vor.u32 %v1516_v43, %v1513_v45 }
 0x1a7   : > { %v1518_v35 = vsel %vm1429_vm11, %v1508_v44, %v1517_v0 }
 0x1aa   : > { %v957_v34 = vpop.f32.mrf.mxu3  ;;  %2728 = vmatmul.msk.bf16.gmra.mxu2 %vm888_vm6, %v1509_v2 }
 0x1ab   : > { %v3650_v49 = vadd.f32 %v1047_v12, %v957_v34  ;;  %v1015_v34 = vpop.f32.mrf.mxu0 }
 0x1ac   : > { %v1360_v3 = vpop.f32.mrf.mxu1 }
 0x1ad   : > { %v1055_v50 = vpop.f32.mrf.mxu2 }
 0x1af   : > { %2641 = vmatmul.msk.bf16.gmra.mxu3 %vm888_vm6, %v3361_v8  ;;  %2834 = vmatmul.msk.bf16.vlgmr.msra.gmra.mxu1 %vm888_vm6, %v3213_v62 }
 0x1b2   : > { %v960_v28 = vpop.f32.mrf.mxu3 }
 0x1b3   : > { %v3658_v1 = vadd.f32 %v1050_v13, %v960_v28  ;;  %v1017_v28 = vpop.f32.mrf.mxu0 }
 0x1b4   : > { %v1362_v58 = vpop.f32.mrf.mxu1 }
 0x1b5   : > { %v1057_v12 = vpop.f32.mrf.mxu2 }
 0x1ba   : > { %v962_v33 = vpop.f32.mrf.mxu3  ;;  %2729 = vmatmul.msk.bf16.gmra.mxu2 %vm888_vm6, %v1518_v35 }
 0x1bb   : > { %v3662_v38 = vadd.f32 %v1052_v52, %v962_v33 }
 0x1bc   : > { %v1365_v2 = vpop.f32.mrf.mxu1 }
 0x1bd   : > { %v1573_v8 = vpop.f32.mrf.mxu2 }
 0x1bf   : > { %2642 = vmatmul.msk.bf16.gmra.mxu3 %vm888_vm6, %v3421_v47  ;;  %2835 = vmatmul.msk.bf16.gmra.mxu1 %vm888_vm6, %v3243_v36  ;;  %v1016_v36 = vadd.f32 %v1015_v34, %v3482_v57 }
 0x1c2   : > { %v965_v62 = vpop.f32.mrf.mxu3 }
 0x1c3   : > { %v3668_v13 = vadd.f32 %v1055_v50, %v965_v62 }
 0x1c4   : > { %v1367_v59 = vpop.f32.mrf.mxu1 }
 0x1c5   : > { %3884 = vst [vmem:[#allocation4_spill] sm:$0xff] %v3668_v13  ;;  %v1575_v20 = vpop.f32.mrf.mxu2 }
 0x1ca   : > { %v967_v44 = vpop.f32.mrf.mxu3  ;;  %2861 = vmatmul.msk.bf16.vlgmr.msra.gmra.mxu2 %vm888_vm6, %v3205_v55  ;;  %v1020_v55 = vpop.f32.mrf.mxu0 }
 0x1cb   : > { %v3672_v52 = vadd.f32 %v1057_v12, %v967_v44  ;;  %v1018_v12 = vadd.f32 %v1017_v28, %v3516_v23 }
 0x1cc   : > { %v1370_v45 = vpop.f32.mrf.mxu1 }
 0x1cd   : > { %3885 = vst [vmem:[#allocation5_spill] sm:$0xff] %v3672_v52  ;;  %v1578_v43 = vpop.f32.mrf.mxu2 }
 0x1cf   : > { %2643 = vmatmul.msk.bf16.gmra.mxu3 %vm888_vm6, %v3463_v37  ;;  %2836 = vmatmul.msk.bf16.gmra.mxu1 %vm888_vm6, %v3288_v9 }
 0x1d2   : > { %v1145_v47 = vpop.f32.mrf.mxu3 }
 0x1d3   : > { %v1190_v50 = vadd.f32 %v1145_v47, %v1016_v36 }
 0x1d4   : > { %v1372_v33 = vpop.f32.mrf.mxu1 }
 0x1d5   : > { %v1400_v0 = vadd.f32 %v1355_v26, %v1190_v50  ;;  %v1580_v35 = vpop.f32.mrf.mxu2  ;;  %v1021_v26 = vadd.f32 %v1020_v55, %v3532_v60 }
 0x1d7   : > { %v3679_v62 = vadd.f32 %v1573_v8, %v1400_v0  ;;  %v1022_v8 = vpop.f32.mrf.mxu0 }
 0x1da   : > { %v1147_v44 = vpop.f32.mrf.mxu3  ;;  %2862 = vmatmul.msk.bf16.gmra.mxu2 %vm888_vm6, %v3235_v27 }
 0x1db   : > { %v1191_v37 = vadd.f32 %v1147_v44, %v1018_v12 }
 0x1dc   : > { %v1375_v57 = vpop.f32.mrf.mxu1 }
 0x1dd   : > { %v1401_v52 = vadd.f32 %v1357_v18, %v1191_v37  ;;  %v1583_v13 = vpop.f32.mrf.mxu2  ;;  %v1023_v18 = vadd.f32 %v1022_v8, %v3558_v10 }
 0x1df   : > { %2748 = vmatmul.msk.bf16.vlgmr.msra.gmra.mxu3 %vm888_vm6, %v3157_v4  ;;  %2837 = vmatmul.msk.bf16.gmra.mxu1 %vm888_vm6, %v3329_v29  ;;  %v3688_v9 = vadd.f32 %v1575_v20, %v1401_v52  ;;  %v1025_v29 = vpop.f32.mrf.mxu0 }
 0x1e2   : > { %v1150_v23 = vpop.f32.mrf.mxu3 }
 0x1e3   : > { %v1192_v34 = vadd.f32 %v1150_v23, %v1021_v26 }
 0x1e4   : > { %v1377_v47 = vpop.f32.mrf.mxu1 }
 0x1e5   : > { %v1402_v28 = vadd.f32 %v1360_v3, %v1192_v34  ;;  %v1585_v36 = vpop.f32.mrf.mxu2  ;;  %v1026_v3 = vadd.f32 %v1025_v29, %v3563_v53 }
 0x1e7   : > { %v3691_v27 = vadd.f32 %v1578_v43, %v1402_v28 }
 0x1ea   : > { %v1152_v50 = vpop.f32.mrf.mxu3  ;;  %2863 = vmatmul.msk.bf16.gmra.mxu2 %vm888_vm6, %v3280_v16  ;;  %v1027_v16 = vpop.f32.mrf.mxu0 }
 0x1eb   : > { %v1193_v4 = vadd.f32 %v1152_v50, %v1023_v18 }
 0x1ec   : > { %v1380_v0 = vpop.f32.mrf.mxu1 }
 0x1ed   : > { %v1403_v20 = vadd.f32 %v1362_v58, %v1193_v4  ;;  %v1588_v52 = vpop.f32.mrf.mxu2  ;;  %v1028_v58 = vadd.f32 %v1027_v16, %v3577_v54  ;;  %v1994_v4 = vld [vmem:[#allocation2 + $0x58] sm:$0x7] }
 0x1ef   : > { %2749 = vmatmul.msk.bf16.gmra.mxu3 %vm888_vm6, %v3208_v56  ;;  %2838 = vmatmul.msk.bf16.gmra.mxu1 %vm888_vm6, %v3390_v6  ;;  %v3700_v60 = vadd.f32 %v1580_v35, %v1403_v20 }
 0x1f2   : > { %v1155_v10 = vpop.f32.mrf.mxu3 }
 0x1f3   : > { %v1194_v43 = vadd.f32 %v1155_v10, %v1026_v3 }
 0x1f4   : > { %v1382_v26 = vpop.f32.mrf.mxu1 }
 0x1f5   : > { %v1404_v55 = vadd.f32 %v1365_v2, %v1194_v43  ;;  %v1590_v12 = vpop.f32.mrf.mxu2 }
 0x1f7   : > { %v3703_v44 = vadd.f32 %v1583_v13, %v1404_v55 }
 0x1fa   : > { %v1157_v37 = vpop.f32.mrf.mxu3  ;;  %2864 = vmatmul.msk.bf16.gmra.mxu2 %vm888_vm6, %v3319_v11 }
 0x1fb   : > { %v1195_v56 = vadd.f32 %v1157_v37, %v1028_v58 }
 0x1fc   : > { %v1385_v11 = vpop.f32.mrf.mxu1 }
 0x1fd   : > { %v1405_v6 = vadd.f32 %v1367_v59, %v1195_v56  ;;  %v1593_v35 = vpop.f32.mrf.mxu2 }
 0x1ff   : > { %2750 = vmatmul.msk.bf16.gmra.mxu3 %vm888_vm6, %v3238_v31  ;;  %2839 = vmatmul.msk.bf16.gmra.mxu1 %vm888_vm6, %v3458_v19  ;;  %v3712_v53 = vadd.f32 %v1585_v36, %v1405_v6 }
 0x202   : > { %v1160_v2 = vpop.f32.mrf.mxu3 }
 0x203   : > { %v1196_v13 = vadd.f32 %v1160_v2, %v3588_v22 }
 0x204   : > { %v1387_v22 = vpop.f32.mrf.mxu1 }
 0x205   : > { %v1406_v54 = vadd.f32 %v1370_v45, %v1196_v13  ;;  %v1595_v8 = vpop.f32.mrf.mxu2 }
 0x207   : > { %v3715_v23 = vadd.f32 %v1588_v52, %v1406_v54 }
 0x20a   : > { %v1162_v34 = vpop.f32.mrf.mxu3  ;;  %2865 = vmatmul.msk.bf16.gmra.mxu2 %vm888_vm6, %v3373_v14 }
 0x20b   : > { %v1197_v59 = vadd.f32 %v1162_v34, %v3599_v7 }
 0x20c   : > { %v1390_v29 = vpop.f32.mrf.mxu1 }
 0x20d   : > { %v1407_v31 = vadd.f32 %v1372_v33, %v1197_v59  ;;  %v1598_v28 = vpop.f32.mrf.mxu2  ;;  %v2003_v33 = vunpack.c.l.b16 %v1994_v4  ;;  %v1931_v59 = vpop.f32.mrf.mxu0 }
 0x20f   : > { %2751 = vmatmul.msk.bf16.gmra.mxu3 %vm888_vm6, %v3283_v21  ;;  %2840 = vmatmul.msk.bf16.gmra.mxu1 %vm888_vm6, %v3508_v40  ;;  %v3724_v19 = vadd.f32 %v1590_v12, %v1407_v31  ;;  %v2004_v52 = vpack.c.b16 %v2003_v33, %v2003_v33 }
 0x211   : > { %v2087_v3 = vshrl.u32 %v2004_v52, 16  ;;  %v2090_v10 = vshll.u32 %v2004_v52, 16 }
 0x212   : > { %v1165_v45 = vpop.f32.mrf.mxu3 }
 0x213   : > { %v1198_v36 = vadd.f32 %v1165_v45, %v3604_v15  ;;  %v2089_v12 = vrot.slane %v2087_v3, 2 }
 0x215   : > { %v1408_v18 = vadd.f32 %v1375_v57, %v1198_v36  ;;  %v1600_v50 = vpop.f32.mrf.mxu2  ;;  %v2241_v36 = vrot.slane %v2004_v52, 3 }
 0x217   : > { %v3727_v14 = vadd.f32 %v1593_v35, %v1408_v18 }
 0x21a   : > { %v1167_v7 = vpop.f32.mrf.mxu3  ;;  %2866 = vmatmul.msk.bf16.gmra.mxu2 %vm888_vm6, %v3438_v25 }
 0x21b   : > { %v1199_v21 = vadd.f32 %v1167_v7, %v3614_v48  ;;  %v1392_v48 = vpop.f32.mrf.mxu1 }
 0x21d   : > { %v1409_v40 = vadd.f32 %v1377_v47, %v1199_v21  ;;  %v1603_v20 = vpop.f32.mrf.mxu2  ;;  %v2092_v47 = vrot.slane %v2090_v10, 3  ;;  %v3888_v10 = vld [vmem:[#allocation5_spill] sm:$0xff] }
 0x21f   : > { %2752 = vmatmul.msk.bf16.gmra.mxu3 %vm888_vm6, %v3322_v17  ;;  %2841 = vmatmul.msk.bf16.gmra.mxu1 %vm888_vm6, %v3554_v61  ;;  %v3736_v15 = vadd.f32 %v1595_v8, %v1409_v40  ;;  %v2093_v17 = vor.u32 %v2092_v47, %v2089_v12 }
 0x221   : > { %v2094_v6 = vsel %vm2005_vm9, %v3548_v32, %v2093_v17 }
 0x222   : > { %v1170_v57 = vpop.f32.mrf.mxu3 }
 0x223   : > { %v1200_v25 = vadd.f32 %v1170_v57, %v3622_v46 }
 0x225   : > { %v1410_v43 = vadd.f32 %v1380_v0, %v1200_v25  ;;  %v1605_v55 = vpop.f32.mrf.mxu2  ;;  %v1395_v0 = vpop.f32.mrf.mxu1 }
 0x227   : > { %v3739_v16 = vadd.f32 %v1598_v28, %v1410_v43 }
 0x22a   : > { %v1172_v58 = vpop.f32.mrf.mxu3  ;;  %2867 = vmatmul.msk.bf16.gmra.mxu2 %vm888_vm6, %v3488_v41 }
 0x22b   : > { %v1201_v61 = vadd.f32 %v1172_v58, %v3633_v51 }
 0x22d   : > { %v1411_v37 = vadd.f32 %v1382_v26, %v1201_v61  ;;  %v1608_v56 = vpop.f32.mrf.mxu2  ;;  %v1397_v51 = vpop.f32.mrf.mxu1 }
 0x22f   : > { %2753 = vmatmul.msk.bf16.gmra.mxu3 %vm888_vm6, %v3378_v63  ;;  %2842 = vmatmul.msk.bf16.gmra.mxu1 %vm888_vm6, %v2094_v6  ;;  %v3749_v46 = vadd.f32 %v1600_v50, %v1411_v37  ;;  %v1933_v50 = vpop.f32.mrf.mxu0  ;;  %v3786_v6 = vld [vmem:[%s3872_s5] ss:$0 sm:$0xff] }
 0x232   : > { %v1175_v35 = vpop.f32.mrf.mxu3 }
 0x233   : > { %v1202_v2 = vadd.f32 %v1175_v35, %v3646_v5 }
 0x235   : > { %v1412_v41 = vadd.f32 %v1385_v11, %v1202_v2  ;;  %v1610_v13 = vpop.f32.mrf.mxu2  ;;  %v2149_v31 = vpop.f32.mrf.mxu1 }
 0x237   : > { %v3752_v54 = vadd.f32 %v1603_v20, %v1412_v41  ;;  %v1936_v52 = vpop.f32.mrf.mxu0 }
 0x23a   : > { %v1177_v26 = vpop.f32.mrf.mxu3  ;;  %2868 = vmatmul.msk.bf16.gmra.mxu2 %vm888_vm6, %v3537_v39  ;;  %v3886_v39 = vrot.slane %v3519_v24, 3 }
 0x23b   : > { %v1203_v32 = vadd.f32 %v1177_v26, %v3650_v49 }
 0x23c   : > { %v2242_v49 = vsel %vm404_vm1, %v3886_v39, %v2241_v36 }
 0x23d   : > { %v1413_v63 = vadd.f32 %v1387_v22, %v1203_v32  ;;  %v1613_v8 = vpop.f32.mrf.mxu2 }
 0x23f   : > { %2754 = vmatmul.msk.bf16.gmra.mxu3 %vm888_vm6, %v3450_v42  ;;  %v3759_v34 = vadd.f32 %v1605_v55, %v1413_v63  ;;  %v1938_v12 = vpop.f32.mrf.mxu0 }
 0x242   : > { %v1180_v5 = vpop.f32.mrf.mxu3 }
 0x243   : > { %v1204_v11 = vadd.f32 %v1180_v5, %v3658_v1  ;;  %v2151_v1 = vpop.f32.mrf.mxu1 }
 0x245   : > { %v1414_v28 = vadd.f32 %v1390_v29, %v1204_v11  ;;  %v1615_v45 = vpop.f32.mrf.mxu2  ;;  %v3887_v29 = vld [vmem:[#allocation4_spill] sm:$0xff] }
 0x247   : > { %v3762_v18 = vadd.f32 %v1608_v56, %v1414_v28  ;;  %v1941_v35 = vpop.f32.mrf.mxu0 }
 0x24a   : > { %v1182_v22 = vpop.f32.mrf.mxu3  ;;  %2869 = vmatmul.msk.bf16.gmra.mxu2 %vm888_vm6, %v2242_v49 }
 0x24b   : > { %v1205_v42 = vadd.f32 %v1182_v22, %v3662_v38  ;;  %v2154_v3 = vpop.f32.mrf.mxu1 }
 0x24d   : > { %v1415_v4 = vadd.f32 %v1392_v48, %v1205_v42  ;;  %v2297_v7 = vpop.f32.mrf.mxu2  ;;  %v3889_v48 = vld [vmem:[#allocation3_spill] sm:$0xff] }
 0x24f   : > { %2755 = vmatmul.msk.bf16.gmra.mxu3 %vm888_vm6, %v3503_v30  ;;  %v3771_v33 = vadd.f32 %v1610_v13, %v1415_v4  ;;  %v1943_v11 = vpop.f32.mrf.mxu0 }
 0x252   : > { %v1185_v21 = vpop.f32.mrf.mxu3 }
 0x253   : > { %v1206_v24 = vadd.f32 %v1185_v21, %v3887_v29  ;;  %v2156_v47 = vpop.f32.mrf.mxu1 }
 0x255   : > { %v1416_v40 = vadd.f32 %v1395_v0, %v1206_v24  ;;  %v2299_v20 = vpop.f32.mrf.mxu2 }
 0x257   : > { %v3774_v57 = vadd.f32 %v1613_v8, %v1416_v40 }
 0x25a   : > { %v1187_v38 = vpop.f32.mrf.mxu3 }
 0x25b   : > { %v1207_v25 = vadd.f32 %v1187_v38, %v3888_v10  ;;  %v2159_v13 = vpop.f32.mrf.mxu1 }
 0x25d   : > { %v1417_v43 = vadd.f32 %v1397_v51, %v1207_v25  ;;  %v2302_v55 = vpop.f32.mrf.mxu2 }
 0x25f   : > { %2756 = vmatmul.msk.bf16.gmra.mxu3 %vm888_vm6, %v3889_v48  ;;  %v3780_v30 = vadd.f32 %v1615_v45, %v1417_v43 }
 0x262   : > { %v1721_v58 = vpop.f32.mrf.mxu3 }
 0x263   : > { %v1766_v17 = vadd.f32 %v1721_v58, %v3679_v62  ;;  %v2161_v28 = vpop.f32.mrf.mxu1 }
 0x265   : > { %v1976_v61 = vadd.f32 %v1931_v59, %v1766_v17  ;;  %v2304_v37 = vpop.f32.mrf.mxu2 }
 0x267   : > { %v2194_v56 = vadd.f32 %v2149_v31, %v1976_v61 }
 0x269   : > { %v2342_v0 = vadd.f32 %v2297_v7, %v2194_v56 }
 0x26a   : > { %v1723_v62 = vpop.f32.mrf.mxu3 }
 0x26b   : > { %v2364_v2 = vadd.f32 %v3786_v6, %v2342_v0  ;;  %v1767_v41 = vadd.f32 %v1723_v62, %v3688_v9 }
 0x26d   : > { %2383 = vst.msk [vmem:[%s3791_s7] sm:$0xff] %vm2382_vm12, %v2364_v2  ;;  %v1977_v51 = vadd.f32 %v1933_v50, %v1767_v41  ;;  %v2307_v26 = vpop.f32.mrf.mxu2  ;;  %v1946_v50 = vpop.f32.mrf.mxu0 }
 0x26f   : > { %v2195_v32 = vadd.f32 %v2151_v1, %v1977_v51 }
 0x271   : > { %v2343_v63 = vadd.f32 %v2299_v20, %v2195_v32 }
 0x272   : > { %v1726_v8 = vpop.f32.mrf.mxu3 }
 0x273   : > { %v2365_v59 = vadd.f32 %v3786_v6, %v2343_v63  ;;  %v1768_v5 = vadd.f32 %v1726_v8, %v3691_v27  ;;  %v2164_v27 = vpop.f32.mrf.mxu1 }
 0x275   : > { %2384 = vst.msk [vmem:[%s3791_s7 + $0x8] sm:$0xff] %vm2382_vm12, %v2365_v59  ;;  %v1978_v31 = vadd.f32 %v1936_v52, %v1768_v5  ;;  %v2309_v9 = vpop.f32.mrf.mxu2  ;;  %v1948_v52 = vpop.f32.mrf.mxu0 }
 0x277   : > { %v2196_v45 = vadd.f32 %v2154_v3, %v1978_v31 }
 0x279   : > { %v2344_v36 = vadd.f32 %v2302_v55, %v2196_v45 }
 0x27a   : > { %v1728_v39 = vpop.f32.mrf.mxu3 }
 0x27b   : > { %v2366_v49 = vadd.f32 %v3786_v6, %v2344_v36  ;;  %v1769_v22 = vadd.f32 %v1728_v39, %v3700_v60  ;;  %v2166_v3 = vpop.f32.mrf.mxu1 }
 0x27d   : > { %2385 = vst.msk [vmem:[%s3791_s7 + $0x10] sm:$0xff] %vm2382_vm12, %v2366_v49  ;;  %v1979_v42 = vadd.f32 %v1938_v12, %v1769_v22  ;;  %v2312_v1 = vpop.f32.mrf.mxu2  ;;  %v1951_v12 = vpop.f32.mrf.mxu0 }
 0x27f   : > { %v2197_v4 = vadd.f32 %v2156_v47, %v1979_v42 }
 0x281   : > { %v2345_v7 = vadd.f32 %v2304_v37, %v2197_v4 }
 0x282   : > { %v1731_v21 = vpop.f32.mrf.mxu3 }
 0x283   : > { %v2367_v29 = vadd.f32 %v3786_v6, %v2345_v7  ;;  %v1770_v24 = vadd.f32 %v1731_v21, %v3703_v44  ;;  %v2169_v61 = vpop.f32.mrf.mxu1 }
 0x285   : > { %2386 = vst.msk [vmem:[%s3791_s7 + $0x18] sm:$0xff] %vm2382_vm12, %v2367_v29  ;;  %v1980_v40 = vadd.f32 %v1941_v35, %v1770_v24  ;;  %v2314_v43 = vpop.f32.mrf.mxu2  ;;  %v1953_v41 = vpop.f32.mrf.mxu0 }
 0x287   : > { %v2198_v20 = vadd.f32 %v2159_v13, %v1980_v40 }
 0x289   : > { %v2346_v60 = vadd.f32 %v2307_v26, %v2198_v20 }
 0x28a   : > { %v1733_v38 = vpop.f32.mrf.mxu3 }
 0x28b   : > { %v2368_v10 = vadd.f32 %v3786_v6, %v2346_v60  ;;  %v1771_v25 = vadd.f32 %v1733_v38, %v3712_v53  ;;  %v2171_v51 = vpop.f32.mrf.mxu1 }
 0x28d   : > { %2387 = vst.msk [vmem:[%s3791_s7 + $0x20] sm:$0xff] %vm2382_vm12, %v2368_v10  ;;  %v1981_v55 = vadd.f32 %v1943_v11, %v1771_v25  ;;  %v2317_v56 = vpop.f32.mrf.mxu2  ;;  %v1956_v11 = vpop.f32.mrf.mxu0 }
 0x28f   : > { %v2199_v48 = vadd.f32 %v2161_v28, %v1981_v55 }
 0x291   : > { %v2347_v44 = vadd.f32 %v2309_v9, %v2199_v48 }
 0x292   : > { %v1736_v47 = vpop.f32.mrf.mxu3 }
 0x293   : > { %v2369_v58 = vadd.f32 %v3786_v6, %v2347_v44  ;;  %v1772_v17 = vadd.f32 %v1736_v47, %v3715_v23 }
 0x295   : > { %2388 = vst.msk [vmem:[%s3791_s7 + $0x28] sm:$0xff] %vm2382_vm12, %v2369_v58  ;;  %v1982_v37 = vadd.f32 %v1946_v50, %v1772_v17  ;;  %v2319_v23 = vpop.f32.mrf.mxu2  ;;  %v1958_v42 = vpop.f32.mrf.mxu0 }
 0x297   : > { %v2200_v53 = vadd.f32 %v2164_v27, %v1982_v37 }
 0x299   : > { %v2348_v0 = vadd.f32 %v2312_v1, %v2200_v53 }
 0x29a   : > { %v1738_v35 = vpop.f32.mrf.mxu3 }
 0x29b   : > { %v2370_v62 = vadd.f32 %v3786_v6, %v2348_v0  ;;  %v1773_v2 = vadd.f32 %v1738_v35, %v3724_v19  ;;  %v2174_v19 = vpop.f32.mrf.mxu1 }
 0x29d   : > { %2389 = vst.msk [vmem:[%s3791_s7 + $0x30] sm:$0xff] %vm2382_vm12, %v2370_v62  ;;  %v1983_v13 = vadd.f32 %v1948_v52, %v1773_v2  ;;  %v2322_v45 = vpop.f32.mrf.mxu2  ;;  %v1961_v24 = vpop.f32.mrf.mxu0 }
 0x29f   : > { %v2201_v26 = vadd.f32 %v2166_v3, %v1983_v13 }
 0x2a1   : > { %v2349_v32 = vadd.f32 %v2314_v43, %v2201_v26 }
 0x2a2   : > { %v1741_v63 = vpop.f32.mrf.mxu3 }
 0x2a3   : > { %v2371_v8 = vadd.f32 %v3786_v6, %v2349_v32  ;;  %v1774_v59 = vadd.f32 %v1741_v63, %v3727_v14  ;;  %v2176_v50 = vpop.f32.mrf.mxu1 }
 0x2a5   : > { %2390 = vst.msk [vmem:[%s3791_s7 + $0x38] sm:$0xff] %vm2382_vm12, %v2371_v8  ;;  %v1984_v5 = vadd.f32 %v1951_v12, %v1774_v59  ;;  %v2324_v1 = vpop.f32.mrf.mxu2  ;;  %v1963_v48 = vpop.f32.mrf.mxu0 }
 0x2a7   : > { %v2202_v31 = vadd.f32 %v2169_v61, %v1984_v5 }
 0x2a9   : > { %v2350_v28 = vadd.f32 %v2317_v56, %v2202_v31 }
 0x2aa   : > { %v1743_v9 = vpop.f32.mrf.mxu3 }
 0x2ab   : > { %v2372_v36 = vadd.f32 %v3786_v6, %v2350_v28  ;;  %v1775_v39 = vadd.f32 %v1743_v9, %v3736_v15  ;;  %v2179_v60 = vpop.f32.mrf.mxu1 }
 0x2ad   : > { %2391 = vst.msk [vmem:[%s3791_s7 + $0x40] sm:$0xff] %vm2382_vm12, %v2372_v36  ;;  %v1985_v49 = vadd.f32 %v1953_v41, %v1775_v39  ;;  %v2327_v38 = vpop.f32.mrf.mxu2  ;;  %v1966_v53 = vpop.f32.mrf.mxu0 }
 0x2af   : > { %v2203_v22 = vadd.f32 %v2171_v51, %v1985_v49 }
 0x2b1   : > { %v2351_v14 = vadd.f32 %v2319_v23, %v2203_v22 }
 0x2b2   : > { %v1746_v4 = vpop.f32.mrf.mxu3 }
 0x2b3   : > { %v2373_v27 = vadd.f32 %v3786_v6, %v2351_v14  ;;  %v1776_v7 = vadd.f32 %v1746_v4, %v3739_v16  ;;  %v2181_v12 = vpop.f32.mrf.mxu1 }
 0x2b5   : > { %2392 = vst.msk [vmem:[%s3791_s7 + $0x48] sm:$0xff] %vm2382_vm12, %v2373_v27  ;;  %v1986_v21 = vadd.f32 %v1956_v11, %v1776_v7  ;;  %v1968_v23 = vpop.f32.mrf.mxu0 }
 0x2b7   : > { %v2204_v29 = vadd.f32 %v2174_v19, %v1986_v21 }
 0x2b9   : > { %v2352_v15 = vadd.f32 %v2322_v45, %v2204_v29 }
 0x2ba   : > { %v1748_v40 = vpop.f32.mrf.mxu3 }
 0x2bb   : > { %v2374_v20 = vadd.f32 %v3786_v6, %v2352_v15  ;;  %v1777_v52 = vadd.f32 %v1748_v40, %v3749_v46  ;;  %v2329_v46 = vpop.f32.mrf.mxu2 }
 0x2bd   : > { %2393 = vst.msk [vmem:[%s3791_s7 + $0x50] sm:$0xff] %vm2382_vm12, %v2374_v20  ;;  %v1987_v3 = vadd.f32 %v1958_v42, %v1777_v52  ;;  %v1971_v19 = vpop.f32.mrf.mxu0 }
 0x2bf   : > { %v2205_v16 = vadd.f32 %v2176_v50, %v1987_v3 }
 0x2c1   : > { %v2353_v10 = vadd.f32 %v2324_v1, %v2205_v16 }
 0x2c2   : > { %v1751_v25 = vpop.f32.mrf.mxu3 }
 0x2c3   : > { %v2375_v43 = vadd.f32 %v3786_v6, %v2353_v10  ;;  %v1778_v55 = vadd.f32 %v1751_v25, %v3752_v54  ;;  %v2184_v54 = vpop.f32.mrf.mxu1  ;;  %v2332_v62 = vpop.f32.mrf.mxu2 }
 0x2c5   : > { %2394 = vst.msk [vmem:[%s3791_s7 + $0x58] sm:$0xff] %vm2382_vm12, %v2375_v43  ;;  %v1988_v44 = vadd.f32 %v1961_v24, %v1778_v55  ;;  %v1973_v4 = vpop.f32.mrf.mxu0 }
 0x2c7   : > { %v2206_v47 = vadd.f32 %v2179_v60, %v1988_v44 }
 0x2c9   : > { %v2354_v58 = vadd.f32 %v2327_v38, %v2206_v47 }
 0x2ca   : > { %v1753_v17 = vpop.f32.mrf.mxu3 }
 0x2cb   : > { %v2376_v61 = vadd.f32 %v3786_v6, %v2354_v58  ;;  %v1779_v37 = vadd.f32 %v1753_v17, %v3759_v34  ;;  %v2186_v32 = vpop.f32.mrf.mxu1  ;;  %v2334_v5 = vpop.f32.mrf.mxu2 }
 0x2cd   : > { %2395 = vst.msk [vmem:[%s3791_s7 + $0x60] sm:$0xff] %vm2382_vm12, %v2376_v61  ;;  %v1989_v56 = vadd.f32 %v1963_v48, %v1779_v37 }
 0x2cf   : > { %v2207_v0 = vadd.f32 %v2181_v12, %v1989_v56 }
 0x2d1   : > { %v2355_v35 = vadd.f32 %v2329_v46, %v2207_v0 }
 0x2d2   : > { %v1756_v2 = vpop.f32.mrf.mxu3 }
 0x2d3   : > { %v2377_v41 = vadd.f32 %v3786_v6, %v2355_v35  ;;  %v1780_v13 = vadd.f32 %v1756_v2, %v3762_v18  ;;  %v2189_v36 = vpop.f32.mrf.mxu1  ;;  %v2337_v49 = vpop.f32.mrf.mxu2 }
 0x2d5   : > { %2396 = vst.msk [vmem:[%s3791_s7 + $0x68] sm:$0xff] %vm2382_vm12, %v2377_v41  ;;  %v1990_v51 = vadd.f32 %v1966_v53, %v1780_v13 }
 0x2d7   : > { %v2208_v26 = vadd.f32 %v2184_v54, %v1990_v51 }
 0x2d9   : > { %v2356_v34 = vadd.f32 %v2332_v62, %v2208_v26 }
 0x2da   : > { %v1758_v63 = vpop.f32.mrf.mxu3 }
 0x2db   : > { %v2378_v8 = vadd.f32 %v3786_v6, %v2356_v34  ;;  %v1781_v59 = vadd.f32 %v1758_v63, %v3771_v33  ;;  %v2191_v7 = vpop.f32.mrf.mxu1 }
 0x2dd   : > { %2397 = vst.msk [vmem:[%s3791_s7 + $0x70] sm:$0xff] %vm2382_vm12, %v2378_v8  ;;  %v1991_v11 = vadd.f32 %v1968_v23, %v1781_v59 }
 0x2df   : > { %v2209_v31 = vadd.f32 %v2186_v32, %v1991_v11 }
 0x2e1   : > { %v2357_v18 = vadd.f32 %v2334_v5, %v2209_v31 }
 0x2e2   : > { %v1761_v28 = vpop.f32.mrf.mxu3 }
 0x2e3   : > { %v2379_v45 = vadd.f32 %v3786_v6, %v2357_v18  ;;  %v1782_v9 = vadd.f32 %v1761_v28, %v3774_v57  ;;  %v2339_v57 = vpop.f32.mrf.mxu2 }
 0x2e5   : > { %2398 = vst.msk [vmem:[%s3791_s7 + $0x78] sm:$0xff] %vm2382_vm12, %v2379_v45  ;;  %v1992_v39 = vadd.f32 %v1971_v19, %v1782_v9 }
 0x2e7   : > { %v2210_v33 = vadd.f32 %v2189_v36, %v1992_v39 }
 0x2e9   : > { %v2358_v22 = vadd.f32 %v2337_v49, %v2210_v33 }
 0x2ea   : > { %v1763_v42 = vpop.f32.mrf.mxu3 }
 0x2eb   : > { %v2380_v14 = vadd.f32 %v3786_v6, %v2358_v22  ;;  %v1783_v50 = vadd.f32 %v1763_v42, %v3780_v30 }
 0x2ed   : > { %2399 = vst.msk [vmem:[%s3791_s7 + $0x80] sm:$0xff] %vm2382_vm12, %v2380_v14  ;;  %v1993_v27 = vadd.f32 %v1973_v4, %v1783_v50 }
 0x2ef   : > { %v2211_v1 = vadd.f32 %v2191_v7, %v1993_v27 }
 0x2f1   : > { %v2359_v21 = vadd.f32 %v2339_v57, %v2211_v1 }
 0x2f3   : > { %v2381_v29 = vadd.f32 %v3786_v6, %v2359_v21 }
 0x2f5   : > { %2400 = vst.msk [vmem:[%s3791_s7 + $0x88] sm:$0xff] %vm2382_vm12, %v2381_v29 }
 0x2f6 PF: > { %s16_s21 = sadd.s32 1, %s2971_s21  }
 0x2f7   : > { %p13_p5 = scmp.ge.s32.totalorder %s16_s21, 4  }
 0x2f9   :  { %15 = sbr.rel (!%p13_p5) target bundleno = 1 (0x1), region = 85 }

</bundles_post_ra>
